<compile_context>
chip_gen: v5e
topology: v5e:2x2
jax: 0.10.0
libtpu: 0.0.40
codegen_flags: <defaults>
</compile_context>

<pallas_src>
import jax
import jax.numpy as jnp
from jax.experimental import pallas as pl
from jax.experimental.pallas import tpu as pltpu

K = 3      # every conv in the model has kernel_size 3
PAD = 8    # max dilation -> one-time per-sample pad of 8 zeros each side


# ----------------------------- in-kernel conv helpers ---------------------------

def _shift_lanes(x, s, lanes):
    """out[:, p] = x[:, (p + s) % lanes]  (static shift).

    Wrapped values only ever land in (masked) pad columns, so circular wrap is
    harmless for all valid output positions."""
    s = s % lanes
    if s == 0:
        return x
    return jnp.concatenate([x[:, s:], x[:, :s]], axis=1)


def _conv_mxu(x, w_taps, b, d, lanes):
    """Dilated 'same' conv via MXU: per-tap matmul, then shift the (small) output.

    x: (C_in, lanes) with pad columns zeroed; w_taps: (K, C_out, C_in); b: (C_out, 1)."""
    acc = None
    for t in range(K):
        y = jnp.dot(w_taps[t], x, preferred_element_type=jnp.float32)   # (C_out, lanes)
        y = _shift_lanes(y, (t - 1) * d, lanes)
        acc = y if acc is None else acc + y
    return acc + b


def _conv_vpu(x, w_taps, b, d, lanes):
    """Same conv, but as broadcast-FMAs on the VPU (for tiny channel counts)."""
    c_in = x.shape[0]
    acc = None
    for t in range(K):
        wt = w_taps[t]                                    # (C_out, C_in)
        y = None
        for ci in range(c_in):
            term = wt[:, ci:ci + 1] * x[ci:ci + 1, :]     # (C_out, lanes), VPU FMA
            y = term if y is None else y + term
        y = _shift_lanes(y, (t - 1) * d, lanes)
        acc = y if acc is None else acc + y
    return acc + b


# ----------------------------------- kernel ------------------------------------

def tcn_kernel(x_ref, w_in_ref, w33_ref, w2_ref, wfc_ref, bias_ref, mask_ref, avg_ref,
               out_ref):
    lanes = x_ref.shape[1]

    x = x_ref[...]          # (20, lanes); pad columns already zero from the wrapper
    w_in = w_in_ref[...]    # (6, 3, 20): [0:3] = conv1a taps, [3:6] = conv3a taps
    w33 = w33_ref[...]      # (9, 3, 3):  conv1 taps of blocks 2..4, block-major
    w2 = w2_ref[...]        # (12, 1, 3): conv2 taps of blocks 1..4, block-major
    wfc = wfc_ref[...]      # (2, 3)
    bias = bias_ref[...]    # (3, 16): packed biases (see pack_params)
    mask = mask_ref[...]    # (1, lanes): 1.0 at valid positions, 0.0 at pad columns
    avg = avg_ref[...]      # (lanes, B_TILE): per-sample averaging matrix (1/L entries)

    # ResBlock 1: 20 -> 3, dilation 1, conv3 shortcut (20-channel convs on the MXU).
    r = jnp.maximum(_conv_mxu(x, w_in[0:3], bias[:, 0:1], 1, lanes), 0.0) * mask
    r2 = _conv_vpu(r, w2[0:3], bias[0:1, 4:5], 1, lanes)             # (1, lanes)
    sc = _conv_mxu(x, w_in[3:6], bias[:, 8:9], 1, lanes)             # (3, lanes)
    h = jnp.maximum(r2 + sc, 0.0) * mask       # (1,L)+(3,L) broadcast, as in PyTorch

    # ResBlocks 2..4: 3 -> 3, identity shortcut, dilations 2/4/8 (VPU broadcast-FMAs).
    for i, d in enumerate((2, 4, 8)):
        w_c1 = w33[3 * i:3 * i + 3]                                   # (3, 3, 3)
        w_c2 = w2[3 * (i + 1):3 * (i + 1) + 3]                        # (3, 1, 3)
        r = jnp.maximum(_conv_vpu(h, w_c1, bias[:, i + 1:i + 2], d, lanes), 0.0) * mask
        r2 = _conv_vpu(r, w_c2, bias[0:1, 5 + i:6 + i], d, lanes)     # (1, lanes)
        h = jnp.maximum(r2 + h, 0.0) * mask

    # AdaptiveAvgPool1d(1) folded into a matmul, then Linear(3, 2); lane-dense output.
    pooled = jnp.dot(h, avg, preferred_element_type=jnp.float32)      # (3, B_TILE)
    logits = jnp.dot(wfc, pooled, preferred_element_type=jnp.float32) + bias[0:2, 9:10]
    out_ref[...] = logits                                             # (2, B_TILE)


# -------------------------------- param packing ---------------------------------

def pack_params(params):
    """Pack the 20 original params into 5 arrays (fewer DMA descriptors / less padding)."""
    (w1a, b1a, w2a, b2a, w3a, b3a,
     w1b, b1b, w2b, b2b,
     w1c, b1c, w2c, b2c,
     w1d, b1d, w2d, b2d,
     fcw, fcb) = params

    w_in = jnp.concatenate([w1a, w3a], axis=0)                        # (6, 3, 20)
    w33 = jnp.concatenate([w1b, w1c, w1d], axis=0)                    # (9, 3, 3)
    w2 = jnp.concatenate([w2a, w2b, w2c, w2d], axis=0)                # (12, 1, 3)

    # bias layout (3, 16):
    #   cols 0..3 : conv1 bias of blocks 1..4  (rows 0..2)
    #   cols 4..7 : conv2 bias of blocks 1..4  (row 0)
    #   col  8    : conv3 bias of block 1      (rows 0..2)
    #   col  9    : fc bias                    (rows 0..1)
    bias = jnp.zeros((3, 16), jnp.float32)
    bias = bias.at[:, 0:1].set(b1a).at[:, 1:2].set(b1b)
    bias = bias.at[:, 2:3].set(b1c).at[:, 3:4].set(b1d)
    bias = bias.at[0:1, 4:5].set(b2a).at[0:1, 5:6].set(b2b)
    bias = bias.at[0:1, 6:7].set(b2c).at[0:1, 7:8].set(b2d)
    bias = bias.at[:, 8:9].set(b3a).at[0:2, 9:10].set(fcb)
    return w_in, w33, w2, fcw, bias


# ---------------------------------- wrapper -------------------------------------

def tcn_forward(x, params, b_tile=None):
    """x: (N, 20, L) float32 -> (N, 2) float32."""
    N, C, L = x.shape
    Lp = L + 2 * PAD

    if b_tile is None:
        # Single batch tile for small batches (block == full array); otherwise 128
        # samples per grid step so the lane axis / output block are 128-multiples.
        b_tile = min(128, max(8, ((N + 7) // 8) * 8))
    n_blocks = pl.cdiv(N, b_tile)
    N_pad = n_blocks * b_tile
    lanes = b_tile * Lp

    # Pre-pad once (max dilation) and flatten (sample, padded position) onto lanes.
    xp = jnp.pad(x, ((0, N_pad - N), (0, 0), (PAD, PAD)))             # (N_pad, C, Lp)
    xf = jnp.transpose(xp, (1, 0, 2)).reshape(C, N_pad * Lp)          # (C, N_pad*Lp)

    # Valid-position mask + per-sample averaging matrix (pool folded into a matmul).
    pos = jnp.arange(lanes, dtype=jnp.int32)
    valid = ((pos % Lp) >= PAD) & ((pos % Lp) < PAD + L)
    mask = valid.astype(jnp.float32)[None, :]                         # (1, lanes)
    samp = pos // Lp
    avg = (valid[:, None] &
           (samp[:, None] == jnp.arange(b_tile, dtype=jnp.int32)[None, :]))
    avg = avg.astype(jnp.float32) / float(L)                          # (lanes, b_tile)

    w_in, w33, w2, wfc, bias = pack_params(params)

    def const_spec(a):
        return pl.BlockSpec(a.shape, lambda b, _nd=a.ndim: (0,) * _nd)

    out = pl.pallas_call(
        tcn_kernel,
        out_shape=jax.ShapeDtypeStruct((2, N_pad), jnp.float32),
        grid=(n_blocks,),
        in_specs=[pl.BlockSpec((C, lanes), lambda b: (0, b)),
                  const_spec(w_in), const_spec(w33), const_spec(w2),
                  const_spec(wfc), const_spec(bias),
                  const_spec(mask), const_spec(avg)],
        out_specs=pl.BlockSpec((2, b_tile), lambda b: (0, b)),
        compiler_params=pltpu.CompilerParams(dimension_semantics=("parallel",)),
    )(xf, w_in, w33, w2, wfc, bias, mask, avg)

    return jnp.transpose(out)[:N]                                     # (N, 2)


# ------------------------------ parameter setup ---------------------------------

def init_params(key):
    """Deterministic synthetic parameters; conv weights as (K, C_out, C_in)."""
    keys = iter(jax.random.split(key, 64))

    def u(shape, scale=0.3):
        return scale * jax.random.uniform(next(keys), shape, jnp.float32, -1.0, 1.0)

    def conv_w(cout, cin):
        # generate in PyTorch layout (C_out, C_in, K), transpose to (K, C_out, C_in)
        w = u((cout, cin, K))
        return jnp.transpose(w, (2, 0, 1))

    params = []
    # resblock1: in=20, out=3, k=3, d=1  (needs conv3 shortcut since 20 != 3)
    params += [conv_w(3, 20), u((3, 1)), conv_w(1, 3), u((1, 1)),
               conv_w(3, 20), u((3, 1))]
    # resblocks 2..4: in=3, out=3 -> identity shortcut (conv3 unused in forward)
    for _ in range(3):
        params += [conv_w(3, 3), u((3, 1)), conv_w(1, 3), u((1, 1))]
    # fc: Linear(3, 2): weight (2, 3), bias (2, 1)
    params += [u((2, 3)), u((2, 1))]
    return params


# ------------------------------ pure-JAX reference ------------------------------

def _conv1d_same(x, w, b, dilation):
    """x: (C_in, L); w: (K, C_out, C_in); b: (C_out, 1) -> (C_out, L)."""
    cin, L = x.shape
    d = dilation
    zeros = jnp.zeros((cin, d), dtype=x.dtype)
    xp = jnp.concatenate([zeros, x, zeros], axis=1)
    acc = jnp.zeros((w.shape[1], L), dtype=jnp.float32)
    for t in range(K):
        acc = acc + jnp.dot(w[t], xp[:, t * d:t * d + L],
                            preferred_element_type=jnp.float32)
    return acc + b


def _resblock_ref(x, w1, b1, w2, b2, dilation, w3=None, b3=None):
    r = jnp.maximum(_conv1d_same(x, w1, b1, dilation), 0.0)
    r = _conv1d_same(r, w2, b2, dilation)                 # (1, L)
    shortcut = _conv1d_same(x, w3, b3, 1) if w3 is not None else x
    return jnp.maximum(r + shortcut, 0.0)


def tcn_reference(x, params):
    (w1a, b1a, w2a, b2a, w3a, b3a,
     w1b, b1b, w2b, b2b,
     w1c, b1c, w2c, b2c,
     w1d, b1d, w2d, b2d,
     fcw, fcb) = params

    def single(xs):
        h = _resblock_ref(xs, w1a, b1a, w2a, b2a, 1, w3a, b3a)
        h = _resblock_ref(h, w1b, b1b, w2b, b2b, 2)
        h = _resblock_ref(h, w1c, b1c, w2c, b2c, 4)
        h = _resblock_ref(h, w1d, b1d, w2d, b2d, 8)
        pooled = jnp.mean(h, axis=-1, keepdims=True)
        return (jnp.dot(fcw, pooled) + fcb)[:, 0]

    return jax.vmap(single)(x)


# ------------------------------------ main ---------------------------------------

if __name__ == "__main__":
    key = jax.random.PRNGKey(0)
    kx, kp = jax.random.split(key)

    N, C, L = 2, 20, 16                      # batch, in_channels (model fixes 20), seq len
    x = jax.random.normal(kx, (N, C, L), jnp.float32)
    params = init_params(kp)

    out = jax.block_until_ready(tcn_forward(x, params))
    ref = tcn_reference(x, params)

    assert out.shape == (N, 2), out.shape
    assert jnp.allclose(out, ref, atol=1e-4, rtol=1e-4), (out, ref)

    print("KERNEL_OK")
</pallas_src>

<mosaic_0001>
module attributes {stable_mosaic.version = 11 : i64} {
  func.func @tcn_kernel(%arg0: i32, %arg1: memref<20x256xf32, #tpu.memory_space<vmem>>, %arg2: memref<6x3x20xf32, #tpu.memory_space<vmem>>, %arg3: memref<9x3x3xf32, #tpu.memory_space<vmem>>, %arg4: memref<12x1x3xf32, #tpu.memory_space<vmem>>, %arg5: memref<2x3xf32, #tpu.memory_space<vmem>>, %arg6: memref<3x16xf32, #tpu.memory_space<vmem>>, %arg7: memref<1x256xf32, #tpu.memory_space<vmem>>, %arg8: memref<256x8xf32, #tpu.memory_space<vmem>>, %arg9: memref<2x8xf32, #tpu.memory_space<vmem>>) attributes {dimension_semantics = [#tpu.dimension_semantics<parallel>], iteration_bounds = array<i64: 1>, scalar_prefetch = 0 : i64, scratch_operands = 0 : i64, tpu.core_type = #tpu.core_type<tc>, window_params = [{transform_indices = @transform_0, window_bounds = array<i64: 20, 256>}, {pipeline_mode = #tpu.pipeline_mode<synchronous>, transform_indices = @transform_1, window_bounds = array<i64: 6, 3, 20>}, {pipeline_mode = #tpu.pipeline_mode<synchronous>, transform_indices = @transform_2, window_bounds = array<i64: 9, 3, 3>}, {pipeline_mode = #tpu.pipeline_mode<synchronous>, transform_indices = @transform_3, window_bounds = array<i64: 12, 1, 3>}, {pipeline_mode = #tpu.pipeline_mode<synchronous>, transform_indices = @transform_4, window_bounds = array<i64: 2, 3>}, {pipeline_mode = #tpu.pipeline_mode<synchronous>, transform_indices = @transform_5, window_bounds = array<i64: 3, 16>}, {pipeline_mode = #tpu.pipeline_mode<synchronous>, transform_indices = @transform_6, window_bounds = array<i64: 1, 256>}, {pipeline_mode = #tpu.pipeline_mode<synchronous>, transform_indices = @transform_7, window_bounds = array<i64: 256, 8>}, {transform_indices = @transform_8, window_bounds = array<i64: 2, 8>}]} {
    %c0 = arith.constant 0 : index
    %c0_0 = arith.constant 0 : index
    %0 = vector.load %arg1[%c0, %c0_0] : memref<20x256xf32, #tpu.memory_space<vmem>>, vector<20x256xf32>
    %c0_1 = arith.constant 0 : index
    %c0_2 = arith.constant 0 : index
    %c0_3 = arith.constant 0 : index
    %1 = vector.load %arg2[%c0_1, %c0_2, %c0_3] : memref<6x3x20xf32, #tpu.memory_space<vmem>>, vector<6x3x20xf32>
    %c0_4 = arith.constant 0 : index
    %c0_5 = arith.constant 0 : index
    %c0_6 = arith.constant 0 : index
    %2 = vector.load %arg3[%c0_4, %c0_5, %c0_6] : memref<9x3x3xf32, #tpu.memory_space<vmem>>, vector<9x3x3xf32>
    %c0_7 = arith.constant 0 : index
    %c0_8 = arith.constant 0 : index
    %c0_9 = arith.constant 0 : index
    %3 = vector.load %arg4[%c0_7, %c0_8, %c0_9] : memref<12x1x3xf32, #tpu.memory_space<vmem>>, vector<12x1x3xf32>
    %c0_10 = arith.constant 0 : index
    %c0_11 = arith.constant 0 : index
    %4 = vector.load %arg5[%c0_10, %c0_11] : memref<2x3xf32, #tpu.memory_space<vmem>>, vector<2x3xf32>
    %c0_12 = arith.constant 0 : index
    %c0_13 = arith.constant 0 : index
    %5 = vector.load %arg6[%c0_12, %c0_13] : memref<3x16xf32, #tpu.memory_space<vmem>>, vector<3x16xf32>
    %c0_14 = arith.constant 0 : index
    %c0_15 = arith.constant 0 : index
    %6 = vector.load %arg7[%c0_14, %c0_15] : memref<1x256xf32, #tpu.memory_space<vmem>>, vector<1x256xf32>
    %c0_16 = arith.constant 0 : index
    %c0_17 = arith.constant 0 : index
    %7 = vector.load %arg8[%c0_16, %c0_17] : memref<256x8xf32, #tpu.memory_space<vmem>>, vector<256x8xf32>
    %8 = vector.extract_strided_slice %1 {offsets = [0, 0, 0], sizes = [3, 3, 20], strides = [1, 1, 1]} : vector<6x3x20xf32> to vector<3x3x20xf32>
    %9 = vector.extract_strided_slice %5 {offsets = [0, 0], sizes = [3, 1], strides = [1, 1]} : vector<3x16xf32> to vector<3x1xf32>
    %10 = vector.extract_strided_slice %8 {offsets = [0, 0, 0], sizes = [1, 3, 20], strides = [1, 1, 1]} : vector<3x3x20xf32> to vector<1x3x20xf32>
    %11 = vector.shape_cast %10 : vector<1x3x20xf32> to vector<3x20xf32>
    %cst = arith.constant dense<0.000000e+00> : vector<3x256xf32>
    %12 = tpu.matmul %11, %0, %cst {dimension_numbers = #tpu.dot_dimension_numbers<[1], [0], [0], [1], [0, 0, 1, 1], [], []>} : vector<3x20xf32>, vector<20x256xf32>, vector<3x256xf32> -> vector<3x256xf32>
    %13 = vector.extract_strided_slice %12 {offsets = [0, 255], sizes = [3, 1], strides = [1, 1]} : vector<3x256xf32> to vector<3x1xf32>
    %14 = vector.extract_strided_slice %12 {offsets = [0, 0], sizes = [3, 255], strides = [1, 1]} : vector<3x256xf32> to vector<3x255xf32>
    %15 = tpu.concatenate %13, %14 in 1 : vector<3x1xf32>, vector<3x255xf32> -> vector<3x256xf32>
    %16 = vector.extract_strided_slice %8 {offsets = [1, 0, 0], sizes = [1, 3, 20], strides = [1, 1, 1]} : vector<3x3x20xf32> to vector<1x3x20xf32>
    %17 = vector.shape_cast %16 : vector<1x3x20xf32> to vector<3x20xf32>
    %cst_18 = arith.constant dense<0.000000e+00> : vector<3x256xf32>
    %18 = tpu.matmul %17, %0, %cst_18 {dimension_numbers = #tpu.dot_dimension_numbers<[1], [0], [0], [1], [0, 0, 1, 1], [], []>} : vector<3x20xf32>, vector<20x256xf32>, vector<3x256xf32> -> vector<3x256xf32>
    %19 = arith.addf %15, %18 : vector<3x256xf32>
    %20 = vector.extract_strided_slice %8 {offsets = [2, 0, 0], sizes = [1, 3, 20], strides = [1, 1, 1]} : vector<3x3x20xf32> to vector<1x3x20xf32>
    %21 = vector.shape_cast %20 : vector<1x3x20xf32> to vector<3x20xf32>
    %cst_19 = arith.constant dense<0.000000e+00> : vector<3x256xf32>
    %22 = tpu.matmul %21, %0, %cst_19 {dimension_numbers = #tpu.dot_dimension_numbers<[1], [0], [0], [1], [0, 0, 1, 1], [], []>} : vector<3x20xf32>, vector<20x256xf32>, vector<3x256xf32> -> vector<3x256xf32>
    %23 = vector.extract_strided_slice %22 {offsets = [0, 1], sizes = [3, 255], strides = [1, 1]} : vector<3x256xf32> to vector<3x255xf32>
    %24 = vector.extract_strided_slice %22 {offsets = [0, 0], sizes = [3, 1], strides = [1, 1]} : vector<3x256xf32> to vector<3x1xf32>
    %25 = tpu.concatenate %23, %24 in 1 : vector<3x255xf32>, vector<3x1xf32> -> vector<3x256xf32>
    %26 = arith.addf %19, %25 : vector<3x256xf32>
    %27 = vector.broadcast %9 : vector<3x1xf32> to vector<3x256xf32>
    %28 = arith.addf %26, %27 : vector<3x256xf32>
    %cst_20 = arith.constant 0.000000e+00 : f32
    %29 = vector.broadcast %cst_20 : f32 to vector<3x256xf32>
    %30 = arith.maximumf %28, %29 : vector<3x256xf32>
    %31 = vector.broadcast %6 : vector<1x256xf32> to vector<3x256xf32>
    %32 = arith.mulf %30, %31 : vector<3x256xf32>
    %33 = vector.extract_strided_slice %3 {offsets = [0, 0, 0], sizes = [3, 1, 3], strides = [1, 1, 1]} : vector<12x1x3xf32> to vector<3x1x3xf32>
    %34 = vector.extract_strided_slice %5 {offsets = [0, 4], sizes = [1, 1], strides = [1, 1]} : vector<3x16xf32> to vector<1x1xf32>
    %35 = vector.extract_strided_slice %33 {offsets = [0, 0, 0], sizes = [1, 1, 3], strides = [1, 1, 1]} : vector<3x1x3xf32> to vector<1x1x3xf32>
    %36 = vector.shape_cast %35 : vector<1x1x3xf32> to vector<1x3xf32>
    %37 = vector.extract_strided_slice %36 {offsets = [0, 0], sizes = [1, 1], strides = [1, 1]} : vector<1x3xf32> to vector<1x1xf32>
    %38 = vector.extract_strided_slice %32 {offsets = [0, 0], sizes = [1, 256], strides = [1, 1]} : vector<3x256xf32> to vector<1x256xf32>
    %39 = vector.broadcast %37 : vector<1x1xf32> to vector<1x256xf32>
    %40 = arith.mulf %39, %38 : vector<1x256xf32>
    %41 = vector.extract_strided_slice %36 {offsets = [0, 1], sizes = [1, 1], strides = [1, 1]} : vector<1x3xf32> to vector<1x1xf32>
    %42 = vector.extract_strided_slice %32 {offsets = [1, 0], sizes = [1, 256], strides = [1, 1]} : vector<3x256xf32> to vector<1x256xf32>
    %43 = vector.broadcast %41 : vector<1x1xf32> to vector<1x256xf32>
    %44 = arith.mulf %43, %42 : vector<1x256xf32>
    %45 = arith.addf %40, %44 : vector<1x256xf32>
    %46 = vector.extract_strided_slice %36 {offsets = [0, 2], sizes = [1, 1], strides = [1, 1]} : vector<1x3xf32> to vector<1x1xf32>
    %47 = vector.extract_strided_slice %32 {offsets = [2, 0], sizes = [1, 256], strides = [1, 1]} : vector<3x256xf32> to vector<1x256xf32>
    %48 = vector.broadcast %46 : vector<1x1xf32> to vector<1x256xf32>
    %49 = arith.mulf %48, %47 : vector<1x256xf32>
    %50 = arith.addf %45, %49 : vector<1x256xf32>
    %51 = vector.extract_strided_slice %50 {offsets = [0, 255], sizes = [1, 1], strides = [1, 1]} : vector<1x256xf32> to vector<1x1xf32>
    %52 = vector.extract_strided_slice %50 {offsets = [0, 0], sizes = [1, 255], strides = [1, 1]} : vector<1x256xf32> to vector<1x255xf32>
    %53 = tpu.concatenate %51, %52 in 1 : vector<1x1xf32>, vector<1x255xf32> -> vector<1x256xf32>
    %54 = vector.extract_strided_slice %33 {offsets = [1, 0, 0], sizes = [1, 1, 3], strides = [1, 1, 1]} : vector<3x1x3xf32> to vector<1x1x3xf32>
    %55 = vector.shape_cast %54 : vector<1x1x3xf32> to vector<1x3xf32>
    %56 = vector.extract_strided_slice %55 {offsets = [0, 0], sizes = [1, 1], strides = [1, 1]} : vector<1x3xf32> to vector<1x1xf32>
    %57 = vector.extract_strided_slice %32 {offsets = [0, 0], sizes = [1, 256], strides = [1, 1]} : vector<3x256xf32> to vector<1x256xf32>
    %58 = vector.broadcast %56 : vector<1x1xf32> to vector<1x256xf32>
    %59 = arith.mulf %58, %57 : vector<1x256xf32>
    %60 = vector.extract_strided_slice %55 {offsets = [0, 1], sizes = [1, 1], strides = [1, 1]} : vector<1x3xf32> to vector<1x1xf32>
    %61 = vector.extract_strided_slice %32 {offsets = [1, 0], sizes = [1, 256], strides = [1, 1]} : vector<3x256xf32> to vector<1x256xf32>
    %62 = vector.broadcast %60 : vector<1x1xf32> to vector<1x256xf32>
    %63 = arith.mulf %62, %61 : vector<1x256xf32>
    %64 = arith.addf %59, %63 : vector<1x256xf32>
    %65 = vector.extract_strided_slice %55 {offsets = [0, 2], sizes = [1, 1], strides = [1, 1]} : vector<1x3xf32> to vector<1x1xf32>
    %66 = vector.extract_strided_slice %32 {offsets = [2, 0], sizes = [1, 256], strides = [1, 1]} : vector<3x256xf32> to vector<1x256xf32>
    %67 = vector.broadcast %65 : vector<1x1xf32> to vector<1x256xf32>
    %68 = arith.mulf %67, %66 : vector<1x256xf32>
    %69 = arith.addf %64, %68 : vector<1x256xf32>
    %70 = arith.addf %53, %69 : vector<1x256xf32>
    %71 = vector.extract_strided_slice %33 {offsets = [2, 0, 0], sizes = [1, 1, 3], strides = [1, 1, 1]} : vector<3x1x3xf32> to vector<1x1x3xf32>
    %72 = vector.shape_cast %71 : vector<1x1x3xf32> to vector<1x3xf32>
    %73 = vector.extract_strided_slice %72 {offsets = [0, 0], sizes = [1, 1], strides = [1, 1]} : vector<1x3xf32> to vector<1x1xf32>
    %74 = vector.extract_strided_slice %32 {offsets = [0, 0], sizes = [1, 256], strides = [1, 1]} : vector<3x256xf32> to vector<1x256xf32>
    %75 = vector.broadcast %73 : vector<1x1xf32> to vector<1x256xf32>
    %76 = arith.mulf %75, %74 : vector<1x256xf32>
    %77 = vector.extract_strided_slice %72 {offsets = [0, 1], sizes = [1, 1], strides = [1, 1]} : vector<1x3xf32> to vector<1x1xf32>
    %78 = vector.extract_strided_slice %32 {offsets = [1, 0], sizes = [1, 256], strides = [1, 1]} : vector<3x256xf32> to vector<1x256xf32>
    %79 = vector.broadcast %77 : vector<1x1xf32> to vector<1x256xf32>
    %80 = arith.mulf %79, %78 : vector<1x256xf32>
    %81 = arith.addf %76, %80 : vector<1x256xf32>
    %82 = vector.extract_strided_slice %72 {offsets = [0, 2], sizes = [1, 1], strides = [1, 1]} : vector<1x3xf32> to vector<1x1xf32>
    %83 = vector.extract_strided_slice %32 {offsets = [2, 0], sizes = [1, 256], strides = [1, 1]} : vector<3x256xf32> to vector<1x256xf32>
    %84 = vector.broadcast %82 : vector<1x1xf32> to vector<1x256xf32>
    %85 = arith.mulf %84, %83 : vector<1x256xf32>
    %86 = arith.addf %81, %85 : vector<1x256xf32>
    %87 = vector.extract_strided_slice %86 {offsets = [0, 1], sizes = [1, 255], strides = [1, 1]} : vector<1x256xf32> to vector<1x255xf32>
    %88 = vector.extract_strided_slice %86 {offsets = [0, 0], sizes = [1, 1], strides = [1, 1]} : vector<1x256xf32> to vector<1x1xf32>
    %89 = tpu.concatenate %87, %88 in 1 : vector<1x255xf32>, vector<1x1xf32> -> vector<1x256xf32>
    %90 = arith.addf %70, %89 : vector<1x256xf32>
    %91 = vector.broadcast %34 : vector<1x1xf32> to vector<1x256xf32>
    %92 = arith.addf %90, %91 : vector<1x256xf32>
    %93 = vector.extract_strided_slice %1 {offsets = [3, 0, 0], sizes = [3, 3, 20], strides = [1, 1, 1]} : vector<6x3x20xf32> to vector<3x3x20xf32>
    %94 = vector.extract_strided_slice %5 {offsets = [0, 8], sizes = [3, 1], strides = [1, 1]} : vector<3x16xf32> to vector<3x1xf32>
    %95 = vector.extract_strided_slice %93 {offsets = [0, 0, 0], sizes = [1, 3, 20], strides = [1, 1, 1]} : vector<3x3x20xf32> to vector<1x3x20xf32>
    %96 = vector.shape_cast %95 : vector<1x3x20xf32> to vector<3x20xf32>
    %cst_21 = arith.constant dense<0.000000e+00> : vector<3x256xf32>
    %97 = tpu.matmul %96, %0, %cst_21 {dimension_numbers = #tpu.dot_dimension_numbers<[1], [0], [0], [1], [0, 0, 1, 1], [], []>} : vector<3x20xf32>, vector<20x256xf32>, vector<3x256xf32> -> vector<3x256xf32>
    %98 = vector.extract_strided_slice %97 {offsets = [0, 255], sizes = [3, 1], strides = [1, 1]} : vector<3x256xf32> to vector<3x1xf32>
    %99 = vector.extract_strided_slice %97 {offsets = [0, 0], sizes = [3, 255], strides = [1, 1]} : vector<3x256xf32> to vector<3x255xf32>
    %100 = tpu.concatenate %98, %99 in 1 : vector<3x1xf32>, vector<3x255xf32> -> vector<3x256xf32>
    %101 = vector.extract_strided_slice %93 {offsets = [1, 0, 0], sizes = [1, 3, 20], strides = [1, 1, 1]} : vector<3x3x20xf32> to vector<1x3x20xf32>
    %102 = vector.shape_cast %101 : vector<1x3x20xf32> to vector<3x20xf32>
    %cst_22 = arith.constant dense<0.000000e+00> : vector<3x256xf32>
    %103 = tpu.matmul %102, %0, %cst_22 {dimension_numbers = #tpu.dot_dimension_numbers<[1], [0], [0], [1], [0, 0, 1, 1], [], []>} : vector<3x20xf32>, vector<20x256xf32>, vector<3x256xf32> -> vector<3x256xf32>
    %104 = arith.addf %100, %103 : vector<3x256xf32>
    %105 = vector.extract_strided_slice %93 {offsets = [2, 0, 0], sizes = [1, 3, 20], strides = [1, 1, 1]} : vector<3x3x20xf32> to vector<1x3x20xf32>
    %106 = vector.shape_cast %105 : vector<1x3x20xf32> to vector<3x20xf32>
    %cst_23 = arith.constant dense<0.000000e+00> : vector<3x256xf32>
    %107 = tpu.matmul %106, %0, %cst_23 {dimension_numbers = #tpu.dot_dimension_numbers<[1], [0], [0], [1], [0, 0, 1, 1], [], []>} : vector<3x20xf32>, vector<20x256xf32>, vector<3x256xf32> -> vector<3x256xf32>
    %108 = vector.extract_strided_slice %107 {offsets = [0, 1], sizes = [3, 255], strides = [1, 1]} : vector<3x256xf32> to vector<3x255xf32>
    %109 = vector.extract_strided_slice %107 {offsets = [0, 0], sizes = [3, 1], strides = [1, 1]} : vector<3x256xf32> to vector<3x1xf32>
    %110 = tpu.concatenate %108, %109 in 1 : vector<3x255xf32>, vector<3x1xf32> -> vector<3x256xf32>
    %111 = arith.addf %104, %110 : vector<3x256xf32>
    %112 = vector.broadcast %94 : vector<3x1xf32> to vector<3x256xf32>
    %113 = arith.addf %111, %112 : vector<3x256xf32>
    %114 = vector.broadcast %92 : vector<1x256xf32> to vector<3x256xf32>
    %115 = arith.addf %114, %113 : vector<3x256xf32>
    %cst_24 = arith.constant 0.000000e+00 : f32
    %116 = vector.broadcast %cst_24 : f32 to vector<3x256xf32>
    %117 = arith.maximumf %115, %116 : vector<3x256xf32>
    %118 = vector.broadcast %6 : vector<1x256xf32> to vector<3x256xf32>
    %119 = arith.mulf %117, %118 : vector<3x256xf32>
    %120 = vector.extract_strided_slice %2 {offsets = [0, 0, 0], sizes = [3, 3, 3], strides = [1, 1, 1]} : vector<9x3x3xf32> to vector<3x3x3xf32>
    %121 = vector.extract_strided_slice %3 {offsets = [3, 0, 0], sizes = [3, 1, 3], strides = [1, 1, 1]} : vector<12x1x3xf32> to vector<3x1x3xf32>
    %122 = vector.extract_strided_slice %5 {offsets = [0, 1], sizes = [3, 1], strides = [1, 1]} : vector<3x16xf32> to vector<3x1xf32>
    %123 = vector.extract_strided_slice %120 {offsets = [0, 0, 0], sizes = [1, 3, 3], strides = [1, 1, 1]} : vector<3x3x3xf32> to vector<1x3x3xf32>
    %124 = vector.shape_cast %123 : vector<1x3x3xf32> to vector<3x3xf32>
    %125 = vector.extract_strided_slice %124 {offsets = [0, 0], sizes = [3, 1], strides = [1, 1]} : vector<3x3xf32> to vector<3x1xf32>
    %126 = vector.extract_strided_slice %119 {offsets = [0, 0], sizes = [1, 256], strides = [1, 1]} : vector<3x256xf32> to vector<1x256xf32>
    %127 = vector.broadcast %125 : vector<3x1xf32> to vector<3x256xf32>
    %128 = vector.broadcast %126 : vector<1x256xf32> to vector<3x256xf32>
    %129 = arith.mulf %127, %128 : vector<3x256xf32>
    %130 = vector.extract_strided_slice %124 {offsets = [0, 1], sizes = [3, 1], strides = [1, 1]} : vector<3x3xf32> to vector<3x1xf32>
    %131 = vector.extract_strided_slice %119 {offsets = [1, 0], sizes = [1, 256], strides = [1, 1]} : vector<3x256xf32> to vector<1x256xf32>
    %132 = vector.broadcast %130 : vector<3x1xf32> to vector<3x256xf32>
    %133 = vector.broadcast %131 : vector<1x256xf32> to vector<3x256xf32>
    %134 = arith.mulf %132, %133 : vector<3x256xf32>
    %135 = arith.addf %129, %134 : vector<3x256xf32>
    %136 = vector.extract_strided_slice %124 {offsets = [0, 2], sizes = [3, 1], strides = [1, 1]} : vector<3x3xf32> to vector<3x1xf32>
    %137 = vector.extract_strided_slice %119 {offsets = [2, 0], sizes = [1, 256], strides = [1, 1]} : vector<3x256xf32> to vector<1x256xf32>
    %138 = vector.broadcast %136 : vector<3x1xf32> to vector<3x256xf32>
    %139 = vector.broadcast %137 : vector<1x256xf32> to vector<3x256xf32>
    %140 = arith.mulf %138, %139 : vector<3x256xf32>
    %141 = arith.addf %135, %140 : vector<3x256xf32>
    %142 = vector.extract_strided_slice %141 {offsets = [0, 254], sizes = [3, 2], strides = [1, 1]} : vector<3x256xf32> to vector<3x2xf32>
    %143 = vector.extract_strided_slice %141 {offsets = [0, 0], sizes = [3, 254], strides = [1, 1]} : vector<3x256xf32> to vector<3x254xf32>
    %144 = tpu.concatenate %142, %143 in 1 : vector<3x2xf32>, vector<3x254xf32> -> vector<3x256xf32>
    %145 = vector.extract_strided_slice %120 {offsets = [1, 0, 0], sizes = [1, 3, 3], strides = [1, 1, 1]} : vector<3x3x3xf32> to vector<1x3x3xf32>
    %146 = vector.shape_cast %145 : vector<1x3x3xf32> to vector<3x3xf32>
    %147 = vector.extract_strided_slice %146 {offsets = [0, 0], sizes = [3, 1], strides = [1, 1]} : vector<3x3xf32> to vector<3x1xf32>
    %148 = vector.extract_strided_slice %119 {offsets = [0, 0], sizes = [1, 256], strides = [1, 1]} : vector<3x256xf32> to vector<1x256xf32>
    %149 = vector.broadcast %147 : vector<3x1xf32> to vector<3x256xf32>
    %150 = vector.broadcast %148 : vector<1x256xf32> to vector<3x256xf32>
    %151 = arith.mulf %149, %150 : vector<3x256xf32>
    %152 = vector.extract_strided_slice %146 {offsets = [0, 1], sizes = [3, 1], strides = [1, 1]} : vector<3x3xf32> to vector<3x1xf32>
    %153 = vector.extract_strided_slice %119 {offsets = [1, 0], sizes = [1, 256], strides = [1, 1]} : vector<3x256xf32> to vector<1x256xf32>
    %154 = vector.broadcast %152 : vector<3x1xf32> to vector<3x256xf32>
    %155 = vector.broadcast %153 : vector<1x256xf32> to vector<3x256xf32>
    %156 = arith.mulf %154, %155 : vector<3x256xf32>
    %157 = arith.addf %151, %156 : vector<3x256xf32>
    %158 = vector.extract_strided_slice %146 {offsets = [0, 2], sizes = [3, 1], strides = [1, 1]} : vector<3x3xf32> to vector<3x1xf32>
    %159 = vector.extract_strided_slice %119 {offsets = [2, 0], sizes = [1, 256], strides = [1, 1]} : vector<3x256xf32> to vector<1x256xf32>
    %160 = vector.broadcast %158 : vector<3x1xf32> to vector<3x256xf32>
    %161 = vector.broadcast %159 : vector<1x256xf32> to vector<3x256xf32>
    %162 = arith.mulf %160, %161 : vector<3x256xf32>
    %163 = arith.addf %157, %162 : vector<3x256xf32>
    %164 = arith.addf %144, %163 : vector<3x256xf32>
    %165 = vector.extract_strided_slice %120 {offsets = [2, 0, 0], sizes = [1, 3, 3], strides = [1, 1, 1]} : vector<3x3x3xf32> to vector<1x3x3xf32>
    %166 = vector.shape_cast %165 : vector<1x3x3xf32> to vector<3x3xf32>
    %167 = vector.extract_strided_slice %166 {offsets = [0, 0], sizes = [3, 1], strides = [1, 1]} : vector<3x3xf32> to vector<3x1xf32>
    %168 = vector.extract_strided_slice %119 {offsets = [0, 0], sizes = [1, 256], strides = [1, 1]} : vector<3x256xf32> to vector<1x256xf32>
    %169 = vector.broadcast %167 : vector<3x1xf32> to vector<3x256xf32>
    %170 = vector.broadcast %168 : vector<1x256xf32> to vector<3x256xf32>
    %171 = arith.mulf %169, %170 : vector<3x256xf32>
    %172 = vector.extract_strided_slice %166 {offsets = [0, 1], sizes = [3, 1], strides = [1, 1]} : vector<3x3xf32> to vector<3x1xf32>
    %173 = vector.extract_strided_slice %119 {offsets = [1, 0], sizes = [1, 256], strides = [1, 1]} : vector<3x256xf32> to vector<1x256xf32>
    %174 = vector.broadcast %172 : vector<3x1xf32> to vector<3x256xf32>
    %175 = vector.broadcast %173 : vector<1x256xf32> to vector<3x256xf32>
    %176 = arith.mulf %174, %175 : vector<3x256xf32>
    %177 = arith.addf %171, %176 : vector<3x256xf32>
    %178 = vector.extract_strided_slice %166 {offsets = [0, 2], sizes = [3, 1], strides = [1, 1]} : vector<3x3xf32> to vector<3x1xf32>
    %179 = vector.extract_strided_slice %119 {offsets = [2, 0], sizes = [1, 256], strides = [1, 1]} : vector<3x256xf32> to vector<1x256xf32>
    %180 = vector.broadcast %178 : vector<3x1xf32> to vector<3x256xf32>
    %181 = vector.broadcast %179 : vector<1x256xf32> to vector<3x256xf32>
    %182 = arith.mulf %180, %181 : vector<3x256xf32>
    %183 = arith.addf %177, %182 : vector<3x256xf32>
    %184 = vector.extract_strided_slice %183 {offsets = [0, 2], sizes = [3, 254], strides = [1, 1]} : vector<3x256xf32> to vector<3x254xf32>
    %185 = vector.extract_strided_slice %183 {offsets = [0, 0], sizes = [3, 2], strides = [1, 1]} : vector<3x256xf32> to vector<3x2xf32>
    %186 = tpu.concatenate %184, %185 in 1 : vector<3x254xf32>, vector<3x2xf32> -> vector<3x256xf32>
    %187 = arith.addf %164, %186 : vector<3x256xf32>
    %188 = vector.broadcast %122 : vector<3x1xf32> to vector<3x256xf32>
    %189 = arith.addf %187, %188 : vector<3x256xf32>
    %cst_25 = arith.constant 0.000000e+00 : f32
    %190 = vector.broadcast %cst_25 : f32 to vector<3x256xf32>
    %191 = arith.maximumf %189, %190 : vector<3x256xf32>
    %192 = vector.broadcast %6 : vector<1x256xf32> to vector<3x256xf32>
    %193 = arith.mulf %191, %192 : vector<3x256xf32>
    %194 = vector.extract_strided_slice %5 {offsets = [0, 5], sizes = [1, 1], strides = [1, 1]} : vector<3x16xf32> to vector<1x1xf32>
    %195 = vector.extract_strided_slice %121 {offsets = [0, 0, 0], sizes = [1, 1, 3], strides = [1, 1, 1]} : vector<3x1x3xf32> to vector<1x1x3xf32>
    %196 = vector.shape_cast %195 : vector<1x1x3xf32> to vector<1x3xf32>
    %197 = vector.extract_strided_slice %196 {offsets = [0, 0], sizes = [1, 1], strides = [1, 1]} : vector<1x3xf32> to vector<1x1xf32>
    %198 = vector.extract_strided_slice %193 {offsets = [0, 0], sizes = [1, 256], strides = [1, 1]} : vector<3x256xf32> to vector<1x256xf32>
    %199 = vector.broadcast %197 : vector<1x1xf32> to vector<1x256xf32>
    %200 = arith.mulf %199, %198 : vector<1x256xf32>
    %201 = vector.extract_strided_slice %196 {offsets = [0, 1], sizes = [1, 1], strides = [1, 1]} : vector<1x3xf32> to vector<1x1xf32>
    %202 = vector.extract_strided_slice %193 {offsets = [1, 0], sizes = [1, 256], strides = [1, 1]} : vector<3x256xf32> to vector<1x256xf32>
    %203 = vector.broadcast %201 : vector<1x1xf32> to vector<1x256xf32>
    %204 = arith.mulf %203, %202 : vector<1x256xf32>
    %205 = arith.addf %200, %204 : vector<1x256xf32>
    %206 = vector.extract_strided_slice %196 {offsets = [0, 2], sizes = [1, 1], strides = [1, 1]} : vector<1x3xf32> to vector<1x1xf32>
    %207 = vector.extract_strided_slice %193 {offsets = [2, 0], sizes = [1, 256], strides = [1, 1]} : vector<3x256xf32> to vector<1x256xf32>
    %208 = vector.broadcast %206 : vector<1x1xf32> to vector<1x256xf32>
    %209 = arith.mulf %208, %207 : vector<1x256xf32>
    %210 = arith.addf %205, %209 : vector<1x256xf32>
    %211 = vector.extract_strided_slice %210 {offsets = [0, 254], sizes = [1, 2], strides = [1, 1]} : vector<1x256xf32> to vector<1x2xf32>
    %212 = vector.extract_strided_slice %210 {offsets = [0, 0], sizes = [1, 254], strides = [1, 1]} : vector<1x256xf32> to vector<1x254xf32>
    %213 = tpu.concatenate %211, %212 in 1 : vector<1x2xf32>, vector<1x254xf32> -> vector<1x256xf32>
    %214 = vector.extract_strided_slice %121 {offsets = [1, 0, 0], sizes = [1, 1, 3], strides = [1, 1, 1]} : vector<3x1x3xf32> to vector<1x1x3xf32>
    %215 = vector.shape_cast %214 : vector<1x1x3xf32> to vector<1x3xf32>
    %216 = vector.extract_strided_slice %215 {offsets = [0, 0], sizes = [1, 1], strides = [1, 1]} : vector<1x3xf32> to vector<1x1xf32>
    %217 = vector.extract_strided_slice %193 {offsets = [0, 0], sizes = [1, 256], strides = [1, 1]} : vector<3x256xf32> to vector<1x256xf32>
    %218 = vector.broadcast %216 : vector<1x1xf32> to vector<1x256xf32>
    %219 = arith.mulf %218, %217 : vector<1x256xf32>
    %220 = vector.extract_strided_slice %215 {offsets = [0, 1], sizes = [1, 1], strides = [1, 1]} : vector<1x3xf32> to vector<1x1xf32>
    %221 = vector.extract_strided_slice %193 {offsets = [1, 0], sizes = [1, 256], strides = [1, 1]} : vector<3x256xf32> to vector<1x256xf32>
    %222 = vector.broadcast %220 : vector<1x1xf32> to vector<1x256xf32>
    %223 = arith.mulf %222, %221 : vector<1x256xf32>
    %224 = arith.addf %219, %223 : vector<1x256xf32>
    %225 = vector.extract_strided_slice %215 {offsets = [0, 2], sizes = [1, 1], strides = [1, 1]} : vector<1x3xf32> to vector<1x1xf32>
    %226 = vector.extract_strided_slice %193 {offsets = [2, 0], sizes = [1, 256], strides = [1, 1]} : vector<3x256xf32> to vector<1x256xf32>
    %227 = vector.broadcast %225 : vector<1x1xf32> to vector<1x256xf32>
    %228 = arith.mulf %227, %226 : vector<1x256xf32>
    %229 = arith.addf %224, %228 : vector<1x256xf32>
    %230 = arith.addf %213, %229 : vector<1x256xf32>
    %231 = vector.extract_strided_slice %121 {offsets = [2, 0, 0], sizes = [1, 1, 3], strides = [1, 1, 1]} : vector<3x1x3xf32> to vector<1x1x3xf32>
    %232 = vector.shape_cast %231 : vector<1x1x3xf32> to vector<1x3xf32>
    %233 = vector.extract_strided_slice %232 {offsets = [0, 0], sizes = [1, 1], strides = [1, 1]} : vector<1x3xf32> to vector<1x1xf32>
    %234 = vector.extract_strided_slice %193 {offsets = [0, 0], sizes = [1, 256], strides = [1, 1]} : vector<3x256xf32> to vector<1x256xf32>
    %235 = vector.broadcast %233 : vector<1x1xf32> to vector<1x256xf32>
    %236 = arith.mulf %235, %234 : vector<1x256xf32>
    %237 = vector.extract_strided_slice %232 {offsets = [0, 1], sizes = [1, 1], strides = [1, 1]} : vector<1x3xf32> to vector<1x1xf32>
    %238 = vector.extract_strided_slice %193 {offsets = [1, 0], sizes = [1, 256], strides = [1, 1]} : vector<3x256xf32> to vector<1x256xf32>
    %239 = vector.broadcast %237 : vector<1x1xf32> to vector<1x256xf32>
    %240 = arith.mulf %239, %238 : vector<1x256xf32>
    %241 = arith.addf %236, %240 : vector<1x256xf32>
    %242 = vector.extract_strided_slice %232 {offsets = [0, 2], sizes = [1, 1], strides = [1, 1]} : vector<1x3xf32> to vector<1x1xf32>
    %243 = vector.extract_strided_slice %193 {offsets = [2, 0], sizes = [1, 256], strides = [1, 1]} : vector<3x256xf32> to vector<1x256xf32>
    %244 = vector.broadcast %242 : vector<1x1xf32> to vector<1x256xf32>
    %245 = arith.mulf %244, %243 : vector<1x256xf32>
    %246 = arith.addf %241, %245 : vector<1x256xf32>
    %247 = vector.extract_strided_slice %246 {offsets = [0, 2], sizes = [1, 254], strides = [1, 1]} : vector<1x256xf32> to vector<1x254xf32>
    %248 = vector.extract_strided_slice %246 {offsets = [0, 0], sizes = [1, 2], strides = [1, 1]} : vector<1x256xf32> to vector<1x2xf32>
    %249 = tpu.concatenate %247, %248 in 1 : vector<1x254xf32>, vector<1x2xf32> -> vector<1x256xf32>
    %250 = arith.addf %230, %249 : vector<1x256xf32>
    %251 = vector.broadcast %194 : vector<1x1xf32> to vector<1x256xf32>
    %252 = arith.addf %250, %251 : vector<1x256xf32>
    %253 = vector.broadcast %252 : vector<1x256xf32> to vector<3x256xf32>
    %254 = arith.addf %253, %119 : vector<3x256xf32>
    %cst_26 = arith.constant 0.000000e+00 : f32
    %255 = vector.broadcast %cst_26 : f32 to vector<3x256xf32>
    %256 = arith.maximumf %254, %255 : vector<3x256xf32>
    %257 = vector.broadcast %6 : vector<1x256xf32> to vector<3x256xf32>
    %258 = arith.mulf %256, %257 : vector<3x256xf32>
    %259 = vector.extract_strided_slice %2 {offsets = [3, 0, 0], sizes = [3, 3, 3], strides = [1, 1, 1]} : vector<9x3x3xf32> to vector<3x3x3xf32>
    %260 = vector.extract_strided_slice %3 {offsets = [6, 0, 0], sizes = [3, 1, 3], strides = [1, 1, 1]} : vector<12x1x3xf32> to vector<3x1x3xf32>
    %261 = vector.extract_strided_slice %5 {offsets = [0, 2], sizes = [3, 1], strides = [1, 1]} : vector<3x16xf32> to vector<3x1xf32>
    %262 = vector.extract_strided_slice %259 {offsets = [0, 0, 0], sizes = [1, 3, 3], strides = [1, 1, 1]} : vector<3x3x3xf32> to vector<1x3x3xf32>
    %263 = vector.shape_cast %262 : vector<1x3x3xf32> to vector<3x3xf32>
    %264 = vector.extract_strided_slice %263 {offsets = [0, 0], sizes = [3, 1], strides = [1, 1]} : vector<3x3xf32> to vector<3x1xf32>
    %265 = vector.extract_strided_slice %258 {offsets = [0, 0], sizes = [1, 256], strides = [1, 1]} : vector<3x256xf32> to vector<1x256xf32>
    %266 = vector.broadcast %264 : vector<3x1xf32> to vector<3x256xf32>
    %267 = vector.broadcast %265 : vector<1x256xf32> to vector<3x256xf32>
    %268 = arith.mulf %266, %267 : vector<3x256xf32>
    %269 = vector.extract_strided_slice %263 {offsets = [0, 1], sizes = [3, 1], strides = [1, 1]} : vector<3x3xf32> to vector<3x1xf32>
    %270 = vector.extract_strided_slice %258 {offsets = [1, 0], sizes = [1, 256], strides = [1, 1]} : vector<3x256xf32> to vector<1x256xf32>
    %271 = vector.broadcast %269 : vector<3x1xf32> to vector<3x256xf32>
    %272 = vector.broadcast %270 : vector<1x256xf32> to vector<3x256xf32>
    %273 = arith.mulf %271, %272 : vector<3x256xf32>
    %274 = arith.addf %268, %273 : vector<3x256xf32>
    %275 = vector.extract_strided_slice %263 {offsets = [0, 2], sizes = [3, 1], strides = [1, 1]} : vector<3x3xf32> to vector<3x1xf32>
    %276 = vector.extract_strided_slice %258 {offsets = [2, 0], sizes = [1, 256], strides = [1, 1]} : vector<3x256xf32> to vector<1x256xf32>
    %277 = vector.broadcast %275 : vector<3x1xf32> to vector<3x256xf32>
    %278 = vector.broadcast %276 : vector<1x256xf32> to vector<3x256xf32>
    %279 = arith.mulf %277, %278 : vector<3x256xf32>
    %280 = arith.addf %274, %279 : vector<3x256xf32>
    %281 = vector.extract_strided_slice %280 {offsets = [0, 252], sizes = [3, 4], strides = [1, 1]} : vector<3x256xf32> to vector<3x4xf32>
    %282 = vector.extract_strided_slice %280 {offsets = [0, 0], sizes = [3, 252], strides = [1, 1]} : vector<3x256xf32> to vector<3x252xf32>
    %283 = tpu.concatenate %281, %282 in 1 : vector<3x4xf32>, vector<3x252xf32> -> vector<3x256xf32>
    %284 = vector.extract_strided_slice %259 {offsets = [1, 0, 0], sizes = [1, 3, 3], strides = [1, 1, 1]} : vector<3x3x3xf32> to vector<1x3x3xf32>
    %285 = vector.shape_cast %284 : vector<1x3x3xf32> to vector<3x3xf32>
    %286 = vector.extract_strided_slice %285 {offsets = [0, 0], sizes = [3, 1], strides = [1, 1]} : vector<3x3xf32> to vector<3x1xf32>
    %287 = vector.extract_strided_slice %258 {offsets = [0, 0], sizes = [1, 256], strides = [1, 1]} : vector<3x256xf32> to vector<1x256xf32>
    %288 = vector.broadcast %286 : vector<3x1xf32> to vector<3x256xf32>
    %289 = vector.broadcast %287 : vector<1x256xf32> to vector<3x256xf32>
    %290 = arith.mulf %288, %289 : vector<3x256xf32>
    %291 = vector.extract_strided_slice %285 {offsets = [0, 1], sizes = [3, 1], strides = [1, 1]} : vector<3x3xf32> to vector<3x1xf32>
    %292 = vector.extract_strided_slice %258 {offsets = [1, 0], sizes = [1, 256], strides = [1, 1]} : vector<3x256xf32> to vector<1x256xf32>
    %293 = vector.broadcast %291 : vector<3x1xf32> to vector<3x256xf32>
    %294 = vector.broadcast %292 : vector<1x256xf32> to vector<3x256xf32>
    %295 = arith.mulf %293, %294 : vector<3x256xf32>
    %296 = arith.addf %290, %295 : vector<3x256xf32>
    %297 = vector.extract_strided_slice %285 {offsets = [0, 2], sizes = [3, 1], strides = [1, 1]} : vector<3x3xf32> to vector<3x1xf32>
    %298 = vector.extract_strided_slice %258 {offsets = [2, 0], sizes = [1, 256], strides = [1, 1]} : vector<3x256xf32> to vector<1x256xf32>
    %299 = vector.broadcast %297 : vector<3x1xf32> to vector<3x256xf32>
    %300 = vector.broadcast %298 : vector<1x256xf32> to vector<3x256xf32>
    %301 = arith.mulf %299, %300 : vector<3x256xf32>
    %302 = arith.addf %296, %301 : vector<3x256xf32>
    %303 = arith.addf %283, %302 : vector<3x256xf32>
    %304 = vector.extract_strided_slice %259 {offsets = [2, 0, 0], sizes = [1, 3, 3], strides = [1, 1, 1]} : vector<3x3x3xf32> to vector<1x3x3xf32>
    %305 = vector.shape_cast %304 : vector<1x3x3xf32> to vector<3x3xf32>
    %306 = vector.extract_strided_slice %305 {offsets = [0, 0], sizes = [3, 1], strides = [1, 1]} : vector<3x3xf32> to vector<3x1xf32>
    %307 = vector.extract_strided_slice %258 {offsets = [0, 0], sizes = [1, 256], strides = [1, 1]} : vector<3x256xf32> to vector<1x256xf32>
    %308 = vector.broadcast %306 : vector<3x1xf32> to vector<3x256xf32>
    %309 = vector.broadcast %307 : vector<1x256xf32> to vector<3x256xf32>
    %310 = arith.mulf %308, %309 : vector<3x256xf32>
    %311 = vector.extract_strided_slice %305 {offsets = [0, 1], sizes = [3, 1], strides = [1, 1]} : vector<3x3xf32> to vector<3x1xf32>
    %312 = vector.extract_strided_slice %258 {offsets = [1, 0], sizes = [1, 256], strides = [1, 1]} : vector<3x256xf32> to vector<1x256xf32>
    %313 = vector.broadcast %311 : vector<3x1xf32> to vector<3x256xf32>
    %314 = vector.broadcast %312 : vector<1x256xf32> to vector<3x256xf32>
    %315 = arith.mulf %313, %314 : vector<3x256xf32>
    %316 = arith.addf %310, %315 : vector<3x256xf32>
    %317 = vector.extract_strided_slice %305 {offsets = [0, 2], sizes = [3, 1], strides = [1, 1]} : vector<3x3xf32> to vector<3x1xf32>
    %318 = vector.extract_strided_slice %258 {offsets = [2, 0], sizes = [1, 256], strides = [1, 1]} : vector<3x256xf32> to vector<1x256xf32>
    %319 = vector.broadcast %317 : vector<3x1xf32> to vector<3x256xf32>
    %320 = vector.broadcast %318 : vector<1x256xf32> to vector<3x256xf32>
    %321 = arith.mulf %319, %320 : vector<3x256xf32>
    %322 = arith.addf %316, %321 : vector<3x256xf32>
    %323 = vector.extract_strided_slice %322 {offsets = [0, 4], sizes = [3, 252], strides = [1, 1]} : vector<3x256xf32> to vector<3x252xf32>
    %324 = vector.extract_strided_slice %322 {offsets = [0, 0], sizes = [3, 4], strides = [1, 1]} : vector<3x256xf32> to vector<3x4xf32>
    %325 = tpu.concatenate %323, %324 in 1 : vector<3x252xf32>, vector<3x4xf32> -> vector<3x256xf32>
    %326 = arith.addf %303, %325 : vector<3x256xf32>
    %327 = vector.broadcast %261 : vector<3x1xf32> to vector<3x256xf32>
    %328 = arith.addf %326, %327 : vector<3x256xf32>
    %cst_27 = arith.constant 0.000000e+00 : f32
    %329 = vector.broadcast %cst_27 : f32 to vector<3x256xf32>
    %330 = arith.maximumf %328, %329 : vector<3x256xf32>
    %331 = vector.broadcast %6 : vector<1x256xf32> to vector<3x256xf32>
    %332 = arith.mulf %330, %331 : vector<3x256xf32>
    %333 = vector.extract_strided_slice %5 {offsets = [0, 6], sizes = [1, 1], strides = [1, 1]} : vector<3x16xf32> to vector<1x1xf32>
    %334 = vector.extract_strided_slice %260 {offsets = [0, 0, 0], sizes = [1, 1, 3], strides = [1, 1, 1]} : vector<3x1x3xf32> to vector<1x1x3xf32>
    %335 = vector.shape_cast %334 : vector<1x1x3xf32> to vector<1x3xf32>
    %336 = vector.extract_strided_slice %335 {offsets = [0, 0], sizes = [1, 1], strides = [1, 1]} : vector<1x3xf32> to vector<1x1xf32>
    %337 = vector.extract_strided_slice %332 {offsets = [0, 0], sizes = [1, 256], strides = [1, 1]} : vector<3x256xf32> to vector<1x256xf32>
    %338 = vector.broadcast %336 : vector<1x1xf32> to vector<1x256xf32>
    %339 = arith.mulf %338, %337 : vector<1x256xf32>
    %340 = vector.extract_strided_slice %335 {offsets = [0, 1], sizes = [1, 1], strides = [1, 1]} : vector<1x3xf32> to vector<1x1xf32>
    %341 = vector.extract_strided_slice %332 {offsets = [1, 0], sizes = [1, 256], strides = [1, 1]} : vector<3x256xf32> to vector<1x256xf32>
    %342 = vector.broadcast %340 : vector<1x1xf32> to vector<1x256xf32>
    %343 = arith.mulf %342, %341 : vector<1x256xf32>
    %344 = arith.addf %339, %343 : vector<1x256xf32>
    %345 = vector.extract_strided_slice %335 {offsets = [0, 2], sizes = [1, 1], strides = [1, 1]} : vector<1x3xf32> to vector<1x1xf32>
    %346 = vector.extract_strided_slice %332 {offsets = [2, 0], sizes = [1, 256], strides = [1, 1]} : vector<3x256xf32> to vector<1x256xf32>
    %347 = vector.broadcast %345 : vector<1x1xf32> to vector<1x256xf32>
    %348 = arith.mulf %347, %346 : vector<1x256xf32>
    %349 = arith.addf %344, %348 : vector<1x256xf32>
    %350 = vector.extract_strided_slice %349 {offsets = [0, 252], sizes = [1, 4], strides = [1, 1]} : vector<1x256xf32> to vector<1x4xf32>
    %351 = vector.extract_strided_slice %349 {offsets = [0, 0], sizes = [1, 252], strides = [1, 1]} : vector<1x256xf32> to vector<1x252xf32>
    %352 = tpu.concatenate %350, %351 in 1 : vector<1x4xf32>, vector<1x252xf32> -> vector<1x256xf32>
    %353 = vector.extract_strided_slice %260 {offsets = [1, 0, 0], sizes = [1, 1, 3], strides = [1, 1, 1]} : vector<3x1x3xf32> to vector<1x1x3xf32>
    %354 = vector.shape_cast %353 : vector<1x1x3xf32> to vector<1x3xf32>
    %355 = vector.extract_strided_slice %354 {offsets = [0, 0], sizes = [1, 1], strides = [1, 1]} : vector<1x3xf32> to vector<1x1xf32>
    %356 = vector.extract_strided_slice %332 {offsets = [0, 0], sizes = [1, 256], strides = [1, 1]} : vector<3x256xf32> to vector<1x256xf32>
    %357 = vector.broadcast %355 : vector<1x1xf32> to vector<1x256xf32>
    %358 = arith.mulf %357, %356 : vector<1x256xf32>
    %359 = vector.extract_strided_slice %354 {offsets = [0, 1], sizes = [1, 1], strides = [1, 1]} : vector<1x3xf32> to vector<1x1xf32>
    %360 = vector.extract_strided_slice %332 {offsets = [1, 0], sizes = [1, 256], strides = [1, 1]} : vector<3x256xf32> to vector<1x256xf32>
    %361 = vector.broadcast %359 : vector<1x1xf32> to vector<1x256xf32>
    %362 = arith.mulf %361, %360 : vector<1x256xf32>
    %363 = arith.addf %358, %362 : vector<1x256xf32>
    %364 = vector.extract_strided_slice %354 {offsets = [0, 2], sizes = [1, 1], strides = [1, 1]} : vector<1x3xf32> to vector<1x1xf32>
    %365 = vector.extract_strided_slice %332 {offsets = [2, 0], sizes = [1, 256], strides = [1, 1]} : vector<3x256xf32> to vector<1x256xf32>
    %366 = vector.broadcast %364 : vector<1x1xf32> to vector<1x256xf32>
    %367 = arith.mulf %366, %365 : vector<1x256xf32>
    %368 = arith.addf %363, %367 : vector<1x256xf32>
    %369 = arith.addf %352, %368 : vector<1x256xf32>
    %370 = vector.extract_strided_slice %260 {offsets = [2, 0, 0], sizes = [1, 1, 3], strides = [1, 1, 1]} : vector<3x1x3xf32> to vector<1x1x3xf32>
    %371 = vector.shape_cast %370 : vector<1x1x3xf32> to vector<1x3xf32>
    %372 = vector.extract_strided_slice %371 {offsets = [0, 0], sizes = [1, 1], strides = [1, 1]} : vector<1x3xf32> to vector<1x1xf32>
    %373 = vector.extract_strided_slice %332 {offsets = [0, 0], sizes = [1, 256], strides = [1, 1]} : vector<3x256xf32> to vector<1x256xf32>
    %374 = vector.broadcast %372 : vector<1x1xf32> to vector<1x256xf32>
    %375 = arith.mulf %374, %373 : vector<1x256xf32>
    %376 = vector.extract_strided_slice %371 {offsets = [0, 1], sizes = [1, 1], strides = [1, 1]} : vector<1x3xf32> to vector<1x1xf32>
    %377 = vector.extract_strided_slice %332 {offsets = [1, 0], sizes = [1, 256], strides = [1, 1]} : vector<3x256xf32> to vector<1x256xf32>
    %378 = vector.broadcast %376 : vector<1x1xf32> to vector<1x256xf32>
    %379 = arith.mulf %378, %377 : vector<1x256xf32>
    %380 = arith.addf %375, %379 : vector<1x256xf32>
    %381 = vector.extract_strided_slice %371 {offsets = [0, 2], sizes = [1, 1], strides = [1, 1]} : vector<1x3xf32> to vector<1x1xf32>
    %382 = vector.extract_strided_slice %332 {offsets = [2, 0], sizes = [1, 256], strides = [1, 1]} : vector<3x256xf32> to vector<1x256xf32>
    %383 = vector.broadcast %381 : vector<1x1xf32> to vector<1x256xf32>
    %384 = arith.mulf %383, %382 : vector<1x256xf32>
    %385 = arith.addf %380, %384 : vector<1x256xf32>
    %386 = vector.extract_strided_slice %385 {offsets = [0, 4], sizes = [1, 252], strides = [1, 1]} : vector<1x256xf32> to vector<1x252xf32>
    %387 = vector.extract_strided_slice %385 {offsets = [0, 0], sizes = [1, 4], strides = [1, 1]} : vector<1x256xf32> to vector<1x4xf32>
    %388 = tpu.concatenate %386, %387 in 1 : vector<1x252xf32>, vector<1x4xf32> -> vector<1x256xf32>
    %389 = arith.addf %369, %388 : vector<1x256xf32>
    %390 = vector.broadcast %333 : vector<1x1xf32> to vector<1x256xf32>
    %391 = arith.addf %389, %390 : vector<1x256xf32>
    %392 = vector.broadcast %391 : vector<1x256xf32> to vector<3x256xf32>
    %393 = arith.addf %392, %258 : vector<3x256xf32>
    %cst_28 = arith.constant 0.000000e+00 : f32
    %394 = vector.broadcast %cst_28 : f32 to vector<3x256xf32>
    %395 = arith.maximumf %393, %394 : vector<3x256xf32>
    %396 = vector.broadcast %6 : vector<1x256xf32> to vector<3x256xf32>
    %397 = arith.mulf %395, %396 : vector<3x256xf32>
    %398 = vector.extract_strided_slice %2 {offsets = [6, 0, 0], sizes = [3, 3, 3], strides = [1, 1, 1]} : vector<9x3x3xf32> to vector<3x3x3xf32>
    %399 = vector.extract_strided_slice %3 {offsets = [9, 0, 0], sizes = [3, 1, 3], strides = [1, 1, 1]} : vector<12x1x3xf32> to vector<3x1x3xf32>
    %400 = vector.extract_strided_slice %5 {offsets = [0, 3], sizes = [3, 1], strides = [1, 1]} : vector<3x16xf32> to vector<3x1xf32>
    %401 = vector.extract_strided_slice %398 {offsets = [0, 0, 0], sizes = [1, 3, 3], strides = [1, 1, 1]} : vector<3x3x3xf32> to vector<1x3x3xf32>
    %402 = vector.shape_cast %401 : vector<1x3x3xf32> to vector<3x3xf32>
    %403 = vector.extract_strided_slice %402 {offsets = [0, 0], sizes = [3, 1], strides = [1, 1]} : vector<3x3xf32> to vector<3x1xf32>
    %404 = vector.extract_strided_slice %397 {offsets = [0, 0], sizes = [1, 256], strides = [1, 1]} : vector<3x256xf32> to vector<1x256xf32>
    %405 = vector.broadcast %403 : vector<3x1xf32> to vector<3x256xf32>
    %406 = vector.broadcast %404 : vector<1x256xf32> to vector<3x256xf32>
    %407 = arith.mulf %405, %406 : vector<3x256xf32>
    %408 = vector.extract_strided_slice %402 {offsets = [0, 1], sizes = [3, 1], strides = [1, 1]} : vector<3x3xf32> to vector<3x1xf32>
    %409 = vector.extract_strided_slice %397 {offsets = [1, 0], sizes = [1, 256], strides = [1, 1]} : vector<3x256xf32> to vector<1x256xf32>
    %410 = vector.broadcast %408 : vector<3x1xf32> to vector<3x256xf32>
    %411 = vector.broadcast %409 : vector<1x256xf32> to vector<3x256xf32>
    %412 = arith.mulf %410, %411 : vector<3x256xf32>
    %413 = arith.addf %407, %412 : vector<3x256xf32>
    %414 = vector.extract_strided_slice %402 {offsets = [0, 2], sizes = [3, 1], strides = [1, 1]} : vector<3x3xf32> to vector<3x1xf32>
    %415 = vector.extract_strided_slice %397 {offsets = [2, 0], sizes = [1, 256], strides = [1, 1]} : vector<3x256xf32> to vector<1x256xf32>
    %416 = vector.broadcast %414 : vector<3x1xf32> to vector<3x256xf32>
    %417 = vector.broadcast %415 : vector<1x256xf32> to vector<3x256xf32>
    %418 = arith.mulf %416, %417 : vector<3x256xf32>
    %419 = arith.addf %413, %418 : vector<3x256xf32>
    %420 = vector.extract_strided_slice %419 {offsets = [0, 248], sizes = [3, 8], strides = [1, 1]} : vector<3x256xf32> to vector<3x8xf32>
    %421 = vector.extract_strided_slice %419 {offsets = [0, 0], sizes = [3, 248], strides = [1, 1]} : vector<3x256xf32> to vector<3x248xf32>
    %422 = tpu.concatenate %420, %421 in 1 : vector<3x8xf32>, vector<3x248xf32> -> vector<3x256xf32>
    %423 = vector.extract_strided_slice %398 {offsets = [1, 0, 0], sizes = [1, 3, 3], strides = [1, 1, 1]} : vector<3x3x3xf32> to vector<1x3x3xf32>
    %424 = vector.shape_cast %423 : vector<1x3x3xf32> to vector<3x3xf32>
    %425 = vector.extract_strided_slice %424 {offsets = [0, 0], sizes = [3, 1], strides = [1, 1]} : vector<3x3xf32> to vector<3x1xf32>
    %426 = vector.extract_strided_slice %397 {offsets = [0, 0], sizes = [1, 256], strides = [1, 1]} : vector<3x256xf32> to vector<1x256xf32>
    %427 = vector.broadcast %425 : vector<3x1xf32> to vector<3x256xf32>
    %428 = vector.broadcast %426 : vector<1x256xf32> to vector<3x256xf32>
    %429 = arith.mulf %427, %428 : vector<3x256xf32>
    %430 = vector.extract_strided_slice %424 {offsets = [0, 1], sizes = [3, 1], strides = [1, 1]} : vector<3x3xf32> to vector<3x1xf32>
    %431 = vector.extract_strided_slice %397 {offsets = [1, 0], sizes = [1, 256], strides = [1, 1]} : vector<3x256xf32> to vector<1x256xf32>
    %432 = vector.broadcast %430 : vector<3x1xf32> to vector<3x256xf32>
    %433 = vector.broadcast %431 : vector<1x256xf32> to vector<3x256xf32>
    %434 = arith.mulf %432, %433 : vector<3x256xf32>
    %435 = arith.addf %429, %434 : vector<3x256xf32>
    %436 = vector.extract_strided_slice %424 {offsets = [0, 2], sizes = [3, 1], strides = [1, 1]} : vector<3x3xf32> to vector<3x1xf32>
    %437 = vector.extract_strided_slice %397 {offsets = [2, 0], sizes = [1, 256], strides = [1, 1]} : vector<3x256xf32> to vector<1x256xf32>
    %438 = vector.broadcast %436 : vector<3x1xf32> to vector<3x256xf32>
    %439 = vector.broadcast %437 : vector<1x256xf32> to vector<3x256xf32>
    %440 = arith.mulf %438, %439 : vector<3x256xf32>
    %441 = arith.addf %435, %440 : vector<3x256xf32>
    %442 = arith.addf %422, %441 : vector<3x256xf32>
    %443 = vector.extract_strided_slice %398 {offsets = [2, 0, 0], sizes = [1, 3, 3], strides = [1, 1, 1]} : vector<3x3x3xf32> to vector<1x3x3xf32>
    %444 = vector.shape_cast %443 : vector<1x3x3xf32> to vector<3x3xf32>
    %445 = vector.extract_strided_slice %444 {offsets = [0, 0], sizes = [3, 1], strides = [1, 1]} : vector<3x3xf32> to vector<3x1xf32>
    %446 = vector.extract_strided_slice %397 {offsets = [0, 0], sizes = [1, 256], strides = [1, 1]} : vector<3x256xf32> to vector<1x256xf32>
    %447 = vector.broadcast %445 : vector<3x1xf32> to vector<3x256xf32>
    %448 = vector.broadcast %446 : vector<1x256xf32> to vector<3x256xf32>
    %449 = arith.mulf %447, %448 : vector<3x256xf32>
    %450 = vector.extract_strided_slice %444 {offsets = [0, 1], sizes = [3, 1], strides = [1, 1]} : vector<3x3xf32> to vector<3x1xf32>
    %451 = vector.extract_strided_slice %397 {offsets = [1, 0], sizes = [1, 256], strides = [1, 1]} : vector<3x256xf32> to vector<1x256xf32>
    %452 = vector.broadcast %450 : vector<3x1xf32> to vector<3x256xf32>
    %453 = vector.broadcast %451 : vector<1x256xf32> to vector<3x256xf32>
    %454 = arith.mulf %452, %453 : vector<3x256xf32>
    %455 = arith.addf %449, %454 : vector<3x256xf32>
    %456 = vector.extract_strided_slice %444 {offsets = [0, 2], sizes = [3, 1], strides = [1, 1]} : vector<3x3xf32> to vector<3x1xf32>
    %457 = vector.extract_strided_slice %397 {offsets = [2, 0], sizes = [1, 256], strides = [1, 1]} : vector<3x256xf32> to vector<1x256xf32>
    %458 = vector.broadcast %456 : vector<3x1xf32> to vector<3x256xf32>
    %459 = vector.broadcast %457 : vector<1x256xf32> to vector<3x256xf32>
    %460 = arith.mulf %458, %459 : vector<3x256xf32>
    %461 = arith.addf %455, %460 : vector<3x256xf32>
    %462 = vector.extract_strided_slice %461 {offsets = [0, 8], sizes = [3, 248], strides = [1, 1]} : vector<3x256xf32> to vector<3x248xf32>
    %463 = vector.extract_strided_slice %461 {offsets = [0, 0], sizes = [3, 8], strides = [1, 1]} : vector<3x256xf32> to vector<3x8xf32>
    %464 = tpu.concatenate %462, %463 in 1 : vector<3x248xf32>, vector<3x8xf32> -> vector<3x256xf32>
    %465 = arith.addf %442, %464 : vector<3x256xf32>
    %466 = vector.broadcast %400 : vector<3x1xf32> to vector<3x256xf32>
    %467 = arith.addf %465, %466 : vector<3x256xf32>
    %cst_29 = arith.constant 0.000000e+00 : f32
    %468 = vector.broadcast %cst_29 : f32 to vector<3x256xf32>
    %469 = arith.maximumf %467, %468 : vector<3x256xf32>
    %470 = vector.broadcast %6 : vector<1x256xf32> to vector<3x256xf32>
    %471 = arith.mulf %469, %470 : vector<3x256xf32>
    %472 = vector.extract_strided_slice %5 {offsets = [0, 7], sizes = [1, 1], strides = [1, 1]} : vector<3x16xf32> to vector<1x1xf32>
    %473 = vector.extract_strided_slice %399 {offsets = [0, 0, 0], sizes = [1, 1, 3], strides = [1, 1, 1]} : vector<3x1x3xf32> to vector<1x1x3xf32>
    %474 = vector.shape_cast %473 : vector<1x1x3xf32> to vector<1x3xf32>
    %475 = vector.extract_strided_slice %474 {offsets = [0, 0], sizes = [1, 1], strides = [1, 1]} : vector<1x3xf32> to vector<1x1xf32>
    %476 = vector.extract_strided_slice %471 {offsets = [0, 0], sizes = [1, 256], strides = [1, 1]} : vector<3x256xf32> to vector<1x256xf32>
    %477 = vector.broadcast %475 : vector<1x1xf32> to vector<1x256xf32>
    %478 = arith.mulf %477, %476 : vector<1x256xf32>
    %479 = vector.extract_strided_slice %474 {offsets = [0, 1], sizes = [1, 1], strides = [1, 1]} : vector<1x3xf32> to vector<1x1xf32>
    %480 = vector.extract_strided_slice %471 {offsets = [1, 0], sizes = [1, 256], strides = [1, 1]} : vector<3x256xf32> to vector<1x256xf32>
    %481 = vector.broadcast %479 : vector<1x1xf32> to vector<1x256xf32>
    %482 = arith.mulf %481, %480 : vector<1x256xf32>
    %483 = arith.addf %478, %482 : vector<1x256xf32>
    %484 = vector.extract_strided_slice %474 {offsets = [0, 2], sizes = [1, 1], strides = [1, 1]} : vector<1x3xf32> to vector<1x1xf32>
    %485 = vector.extract_strided_slice %471 {offsets = [2, 0], sizes = [1, 256], strides = [1, 1]} : vector<3x256xf32> to vector<1x256xf32>
    %486 = vector.broadcast %484 : vector<1x1xf32> to vector<1x256xf32>
    %487 = arith.mulf %486, %485 : vector<1x256xf32>
    %488 = arith.addf %483, %487 : vector<1x256xf32>
    %489 = vector.extract_strided_slice %488 {offsets = [0, 248], sizes = [1, 8], strides = [1, 1]} : vector<1x256xf32> to vector<1x8xf32>
    %490 = vector.extract_strided_slice %488 {offsets = [0, 0], sizes = [1, 248], strides = [1, 1]} : vector<1x256xf32> to vector<1x248xf32>
    %491 = tpu.concatenate %489, %490 in 1 : vector<1x8xf32>, vector<1x248xf32> -> vector<1x256xf32>
    %492 = vector.extract_strided_slice %399 {offsets = [1, 0, 0], sizes = [1, 1, 3], strides = [1, 1, 1]} : vector<3x1x3xf32> to vector<1x1x3xf32>
    %493 = vector.shape_cast %492 : vector<1x1x3xf32> to vector<1x3xf32>
    %494 = vector.extract_strided_slice %493 {offsets = [0, 0], sizes = [1, 1], strides = [1, 1]} : vector<1x3xf32> to vector<1x1xf32>
    %495 = vector.extract_strided_slice %471 {offsets = [0, 0], sizes = [1, 256], strides = [1, 1]} : vector<3x256xf32> to vector<1x256xf32>
    %496 = vector.broadcast %494 : vector<1x1xf32> to vector<1x256xf32>
    %497 = arith.mulf %496, %495 : vector<1x256xf32>
    %498 = vector.extract_strided_slice %493 {offsets = [0, 1], sizes = [1, 1], strides = [1, 1]} : vector<1x3xf32> to vector<1x1xf32>
    %499 = vector.extract_strided_slice %471 {offsets = [1, 0], sizes = [1, 256], strides = [1, 1]} : vector<3x256xf32> to vector<1x256xf32>
    %500 = vector.broadcast %498 : vector<1x1xf32> to vector<1x256xf32>
    %501 = arith.mulf %500, %499 : vector<1x256xf32>
    %502 = arith.addf %497, %501 : vector<1x256xf32>
    %503 = vector.extract_strided_slice %493 {offsets = [0, 2], sizes = [1, 1], strides = [1, 1]} : vector<1x3xf32> to vector<1x1xf32>
    %504 = vector.extract_strided_slice %471 {offsets = [2, 0], sizes = [1, 256], strides = [1, 1]} : vector<3x256xf32> to vector<1x256xf32>
    %505 = vector.broadcast %503 : vector<1x1xf32> to vector<1x256xf32>
    %506 = arith.mulf %505, %504 : vector<1x256xf32>
    %507 = arith.addf %502, %506 : vector<1x256xf32>
    %508 = arith.addf %491, %507 : vector<1x256xf32>
    %509 = vector.extract_strided_slice %399 {offsets = [2, 0, 0], sizes = [1, 1, 3], strides = [1, 1, 1]} : vector<3x1x3xf32> to vector<1x1x3xf32>
    %510 = vector.shape_cast %509 : vector<1x1x3xf32> to vector<1x3xf32>
    %511 = vector.extract_strided_slice %510 {offsets = [0, 0], sizes = [1, 1], strides = [1, 1]} : vector<1x3xf32> to vector<1x1xf32>
    %512 = vector.extract_strided_slice %471 {offsets = [0, 0], sizes = [1, 256], strides = [1, 1]} : vector<3x256xf32> to vector<1x256xf32>
    %513 = vector.broadcast %511 : vector<1x1xf32> to vector<1x256xf32>
    %514 = arith.mulf %513, %512 : vector<1x256xf32>
    %515 = vector.extract_strided_slice %510 {offsets = [0, 1], sizes = [1, 1], strides = [1, 1]} : vector<1x3xf32> to vector<1x1xf32>
    %516 = vector.extract_strided_slice %471 {offsets = [1, 0], sizes = [1, 256], strides = [1, 1]} : vector<3x256xf32> to vector<1x256xf32>
    %517 = vector.broadcast %515 : vector<1x1xf32> to vector<1x256xf32>
    %518 = arith.mulf %517, %516 : vector<1x256xf32>
    %519 = arith.addf %514, %518 : vector<1x256xf32>
    %520 = vector.extract_strided_slice %510 {offsets = [0, 2], sizes = [1, 1], strides = [1, 1]} : vector<1x3xf32> to vector<1x1xf32>
    %521 = vector.extract_strided_slice %471 {offsets = [2, 0], sizes = [1, 256], strides = [1, 1]} : vector<3x256xf32> to vector<1x256xf32>
    %522 = vector.broadcast %520 : vector<1x1xf32> to vector<1x256xf32>
    %523 = arith.mulf %522, %521 : vector<1x256xf32>
    %524 = arith.addf %519, %523 : vector<1x256xf32>
    %525 = vector.extract_strided_slice %524 {offsets = [0, 8], sizes = [1, 248], strides = [1, 1]} : vector<1x256xf32> to vector<1x248xf32>
    %526 = vector.extract_strided_slice %524 {offsets = [0, 0], sizes = [1, 8], strides = [1, 1]} : vector<1x256xf32> to vector<1x8xf32>
    %527 = tpu.concatenate %525, %526 in 1 : vector<1x248xf32>, vector<1x8xf32> -> vector<1x256xf32>
    %528 = arith.addf %508, %527 : vector<1x256xf32>
    %529 = vector.broadcast %472 : vector<1x1xf32> to vector<1x256xf32>
    %530 = arith.addf %528, %529 : vector<1x256xf32>
    %531 = vector.broadcast %530 : vector<1x256xf32> to vector<3x256xf32>
    %532 = arith.addf %531, %397 : vector<3x256xf32>
    %cst_30 = arith.constant 0.000000e+00 : f32
    %533 = vector.broadcast %cst_30 : f32 to vector<3x256xf32>
    %534 = arith.maximumf %532, %533 : vector<3x256xf32>
    %535 = vector.broadcast %6 : vector<1x256xf32> to vector<3x256xf32>
    %536 = arith.mulf %534, %535 : vector<3x256xf32>
    %cst_31 = arith.constant dense<0.000000e+00> : vector<3x8xf32>
    %537 = tpu.matmul %536, %7, %cst_31 {dimension_numbers = #tpu.dot_dimension_numbers<[1], [0], [0], [1], [0, 0, 1, 1], [], []>} : vector<3x256xf32>, vector<256x8xf32>, vector<3x8xf32> -> vector<3x8xf32>
    %cst_32 = arith.constant dense<0.000000e+00> : vector<2x8xf32>
    %538 = tpu.matmul %4, %537, %cst_32 {dimension_numbers = #tpu.dot_dimension_numbers<[1], [0], [0], [1], [0, 0, 1, 1], [], []>} : vector<2x3xf32>, vector<3x8xf32>, vector<2x8xf32> -> vector<2x8xf32>
    %539 = vector.extract_strided_slice %5 {offsets = [0, 9], sizes = [2, 1], strides = [1, 1]} : vector<3x16xf32> to vector<2x1xf32>
    %540 = vector.broadcast %539 : vector<2x1xf32> to vector<2x8xf32>
    %541 = arith.addf %538, %540 : vector<2x8xf32>
    %c0_33 = arith.constant 0 : index
    %c0_34 = arith.constant 0 : index
    %542 = vector.load %arg9[%c0_33, %c0_34] : memref<2x8xf32, #tpu.memory_space<vmem>>, vector<2x8xf32>
    tpu.vector_store %arg9[%c0_33, %c0_34], %541 {strides = array<i32>} : memref<2x8xf32, #tpu.memory_space<vmem>>, vector<2x8xf32>,
    return
  }
  func.func @transform_0(%arg0: i32) -> (i32, i32) {
    %c0_i32 = arith.constant 0 : i32
    %c0_i32_0 = arith.constant 0 : i32
    return %c0_i32, %arg0 : i32, i32
  }
  func.func @transform_1(%arg0: i32) -> (i32, i32, i32) {
    %c0_i32 = arith.constant 0 : i32
    %c0_i32_0 = arith.constant 0 : i32
    %c0_i32_1 = arith.constant 0 : i32
    %c0_i32_2 = arith.constant 0 : i32
    return %c0_i32, %c0_i32_0, %c0_i32_1 : i32, i32, i32
  }
  func.func @transform_2(%arg0: i32) -> (i32, i32, i32) {
    %c0_i32 = arith.constant 0 : i32
    %c0_i32_0 = arith.constant 0 : i32
    %c0_i32_1 = arith.constant 0 : i32
    %c0_i32_2 = arith.constant 0 : i32
    return %c0_i32, %c0_i32_0, %c0_i32_1 : i32, i32, i32
  }
  func.func @transform_3(%arg0: i32) -> (i32, i32, i32) {
    %c0_i32 = arith.constant 0 : i32
    %c0_i32_0 = arith.constant 0 : i32
    %c0_i32_1 = arith.constant 0 : i32
    %c0_i32_2 = arith.constant 0 : i32
    return %c0_i32, %c0_i32_0, %c0_i32_1 : i32, i32, i32
  }
  func.func @transform_4(%arg0: i32) -> (i32, i32) {
    %c0_i32 = arith.constant 0 : i32
    %c0_i32_0 = arith.constant 0 : i32
    %c0_i32_1 = arith.constant 0 : i32
    return %c0_i32, %c0_i32_0 : i32, i32
  }
  func.func @transform_5(%arg0: i32) -> (i32, i32) {
    %c0_i32 = arith.constant 0 : i32
    %c0_i32_0 = arith.constant 0 : i32
    %c0_i32_1 = arith.constant 0 : i32
    return %c0_i32, %c0_i32_0 : i32, i32
  }
  func.func @transform_6(%arg0: i32) -> (i32, i32) {
    %c0_i32 = arith.constant 0 : i32
    %c0_i32_0 = arith.constant 0 : i32
    %c0_i32_1 = arith.constant 0 : i32
    return %c0_i32, %c0_i32_0 : i32, i32
  }
  func.func @transform_7(%arg0: i32) -> (i32, i32) {
    %c0_i32 = arith.constant 0 : i32
    %c0_i32_0 = arith.constant 0 : i32
    %c0_i32_1 = arith.constant 0 : i32
    return %c0_i32, %c0_i32_0 : i32, i32
  }
  func.func @transform_8(%arg0: i32) -> (i32, i32) {
    %c0_i32 = arith.constant 0 : i32
    %c0_i32_0 = arith.constant 0 : i32
    return %c0_i32, %arg0 : i32, i32
  }
}

</mosaic_0001>

<bundles_post_ra>
// kernel: tpu_custom_call.1
= control target key start
LH: loop header
LB: loop body
LE: loop exit
PB: predicated region body
PF: predicated region fallthrough
CT: control target
= control target key end

     0   :  { %vm102_vm0 = vcmask 1043456   ;;  %vm98_vm1 = vcmask 162816   ;;  %s2196_s0 = inlined_call_operand.vmem [shape: f32[20,256], index: 0, kind: input, shape index: {}]   ;;  %s2197_s1 = inlined_call_operand.vmem [shape: f32[6,3,20], index: 1, kind: input, shape index: {}]   ;;  %s2198_s2 = inlined_call_operand.vmem [shape: f32[9,3,3], index: 2, kind: input, shape index: {}]   ;;  %s2199_s3 = inlined_call_operand.vmem [shape: f32[12,1,3], index: 3, kind: input, shape index: {}]   ;;  %s2200_s4 = inlined_call_operand.vmem [shape: f32[2,3], index: 4, kind: input, shape index: {}]   ;;  %s2201_s5 = inlined_call_operand.vmem [shape: f32[3,16], index: 5, kind: input, shape index: {}]   ;;  %s2202_s6 = inlined_call_operand.vmem [shape: f32[1,256], index: 6, kind: input, shape index: {}]   ;;  %s2203_s7 = inlined_call_operand.vmem [shape: f32[256,8], index: 7, kind: input, shape index: {}]   ;;  %s2204_s8 = inlined_call_operand.hbm [shape: f32[2,8], index: 8, kind: output, shape index: {}]  }
   0x1   :  { %v34_v0 = vld [vmem:[%s2196_s0 + $0x20] sm:$0xf]  ;;  %v35_v1 = vld [vmem:[%s2196_s0 + $0x28] sm:$0xf]  ;;  %v32_v2 = vld [vmem:[%s2196_s0 + $0x10] sm:$0xff] }
   0x2   :  { %1485 = vmatpush.msk.msra.mxu3 %vm102_vm0, %v34_v0  ;;  %1487 = vmatpush.msk.msra.mxu2 %vm102_vm0, %v35_v1  ;;  %v33_v3 = vld [vmem:[%s2196_s0 + $0x18] sm:$0xff]  ;;  %v30_v4 = vld [vmem:[%s2196_s0] sm:$0xff]  ;;  %v31_v5 = vld [vmem:[%s2196_s0 + $0x8] sm:$0xff] }
   0x3   :  { %1495 = vmatpush.msk.msra.mxu1 %vm102_vm0, %v35_v1  ;;  %1501 = vmatpush.msk.msra.mxu0 %vm102_vm0, %v34_v0  ;;  %v36_v6 = vld [vmem:[%s2197_s1] sm:$0x7] }
   0x4   :  { %123 = vmatpush.msra.mxu3 %v32_v2  ;;  %143 = vmatpush.msra.mxu2 %v33_v3 }
   0x5   :  { %13 = vsyncpa [#allocation3], 0  ;;  %243 = vmatpush.msra.mxu1 %v33_v3  ;;  %496 = vmatpush.msra.mxu0 %v32_v2  ;;  %v38_v7 = vld [vmem:[%s2197_s1 + $0x8] sm:$0x7]  ;;  %v37_v8 = vld [vmem:[%s2197_s1 + $0x4] sm:$0x7] }
   0x6   :  { %124 = vmatpush.msra.mxu3 %v30_v4  ;;  %144 = vmatpush.msra.mxu2 %v31_v5  ;;  %v39_v9 = vld [vmem:[%s2197_s1 + $0xc] sm:$0x7]  ;;  %v41_v10 = vld [vmem:[%s2197_s1 + $0x14] sm:$0x7]  ;;  %v1733_v11 = vld [vmem:[%s2201_s5] sm:$0x7] }
   0x7   :  { %1486 = vmatmul.msk.f32.vlgmr.msra.gmra.mxu3 %vm98_vm1, %v36_v6  ;;  %1488 = vmatmul.msk.f32.vlgmr.msra.gmra.mxu2 %vm98_vm1, %v36_v6  ;;  %v1611_v12 = vmov 0   ;;  %v1612_v13 = vmov 2   ;;  %v51_v14 = vld [vmem:[%s2199_s3] sm:$0x1]  ;;  %v1613_v15 = vmov 1   ;;  %s1614_s10 = smov 127  }
   0x8   :  { %1491 = vmatpush.msk.msrb.mxu3 %vm102_vm0, %v35_v1  ;;  %244 = vmatpush.msra.mxu1 %v31_v5  ;;  %v53_v16 = vld [vmem:[%s2199_s3 + $0x2] sm:$0x1]  ;;  %s1615_s11 = smov 1   ;;  %v52_v21 = vld [vmem:[%s2199_s3 + $0x1] sm:$0x1]  ;;  %vm156_vm2 = vcmask 7168  }
   0x9   :  { %1496 = vmatmul.msk.f32.vlgmr.msra.gmra.mxu1 %vm98_vm1, %v38_v7  ;;  %1489 = vmatpush.msk.msrb.mxu2 %vm102_vm0, %v34_v0  ;;  %v40_v24 = vld [vmem:[%s2197_s1 + $0x10] sm:$0x7]  ;;  %vm255_vm3 = vcmask 1039360   ;;  %v1616_v36 = vmov 4   ;;  %v1617_v37 = vmov 8   ;;  %s1618_s25 = smov 2  }
   0xa   :  { %198 = vmatpush.msrb.mxu3 %v33_v3  ;;  %1503 = vmatpush.msk.msrb.mxu1 %vm102_vm0, %v35_v1  ;;  %v65_v41 = vld [vmem:[%s2202_s6] sm:$0x3]  ;;  %s1619_s26 = smov 126   ;;  %vm630_vm4 = vcmask 15360   ;;  %vm689_vm5 = vcmask 1031168   ;;  %s1621_s13 = smov 4  }
   0xb   :  { %178 = vmatpush.msrb.mxu2 %v32_v2  ;;  %497 = vmatpush.msra.mxu0 %v30_v4  ;;  %v1773_v47 = vperm.slane %v65_v41, 0  ;;  %v1775_v48 = vperm.slane %v65_v41, 1  ;;  %s1622_s14 = smov 124   ;;  %vm897_vm6 = vcmask 31744   ;;  %vm956_vm7 = vcmask 1014784   ;;  %s1629_s6 = smov [#allocation2]  }
   0xc   :  { %199 = vmatpush.msrb.mxu3 %v31_v5  ;;  %516 = vmatpush.msrb.mxu1 %v33_v3  ;;  %vm1164_vm8 = vcmask 64512   ;;  %vm1223_vm9 = vcmask 982016   ;;  %vm1443_vm10 = vcmask 1042432   ;;  %vm1439_vm11 = vcmask 23552   ;;  %s1474_s17 = sshll.u32 %s1629_s6, 4  ;;  %s1476_s20 = sshll.u32 %s2204_s8, 4  ;;  %s1475_s17 = int_to_ptr.vmem [resolvable:$true] %s1474_s17  ;;  %s1477_s20 = int_to_ptr.hbm [resolvable:$true] %s1476_s20 }
   0xd   :  { %179 = vmatpush.msrb.mxu2 %v30_v4  ;;  %1530 = vset.pattern.permute.xlu2 %v1611_v12  ;;  %vm1467_vm12 = vcmask 58368  }
   0xe   :  { %1493 = vmatpush.msk.msra.mxu3 %vm102_vm0, %v34_v0  ;;  %517 = vmatpush.msrb.mxu1 %v31_v5 }
   0xf   :  { %1497 = vmatpush.msk.msra.mxu2 %vm102_vm0, %v34_v0  ;;  %1492 = vmatmul.msk.f32.vlgmr.msrb.gmra.mxu3 %vm98_vm1, %v37_v8 }
  0x10   :  { %1490 = vmatmul.msk.f32.vlgmr.msrb.gmra.mxu2 %vm98_vm1, %v37_v8  ;;  %223 = vmatpush.msra.mxu3 %v32_v2 }
  0x11   :  { %442 = vmatpush.msra.mxu2 %v32_v2  ;;  %1532 = vset.pattern.permute.xlu0 %v1611_v12 }
  0x12   :  { %224 = vmatpush.msra.mxu3 %v30_v4  ;;  %265 = vperm.xlu2 %1530, %v1733_v11  }
  0x13   :  { %443 = vmatpush.msra.mxu2 %v30_v4  ;;  %1533 = vset.pattern.permute.xlu1 %v1612_v13 }
  0x14   :  { %1499 = vmatpush.msk.msrb.mxu3 %vm102_vm0, %v35_v1  ;;  %1502 = vmatmul.msk.f32.vlgmr.msra.gmra.mxu0 %vm98_vm1, %v40_v24 }
  0x15   :  { %1505 = vmatpush.msk.msrb.mxu2 %vm102_vm0, %v34_v0  ;;  %1504 = vmatmul.msk.f32.vlgmr.msrb.gmra.mxu1 %vm98_vm1, %v40_v24 }
  0x16   :  { %462 = vmatpush.msrb.mxu3 %v33_v3 }
  0x17   :  { %541 = vmatpush.msrb.mxu2 %v32_v2  ;;  %1494 = vmatmul.msk.f32.vlgmr.msra.gmra.mxu3 %vm98_vm1, %v38_v7 }
  0x18   :  { %1498 = vmatmul.msk.f32.vlgmr.msra.gmra.mxu2 %vm98_vm1, %v39_v9  ;;  %463 = vmatpush.msrb.mxu3 %v31_v5 }
  0x19   :  { %542 = vmatpush.msrb.mxu2 %v30_v4 }
  0x1a   :  { %1507 = vmatpush.msk.msra.mxu3 %vm102_vm0, %v35_v1  ;;  %1531 = vset.pattern.permute.xlu2 %v1613_v15 }
  0x1b   :  { %288 = vperm.xlu2 %1531, %v51_v14  }
  0x1c   :  { %561 = vmatpush.msra.mxu3 %v33_v3 }
  0x1e   :  { %562 = vmatpush.msra.mxu3 %v31_v5 }
  0x1f   :  { %1500 = vmatmul.msk.f32.vlgmr.msrb.gmra.mxu3 %vm98_vm1, %v39_v9 }
  0x20   :  { %1506 = vmatmul.msk.f32.vlgmr.msrb.gmra.mxu2 %vm98_vm1, %v41_v10 }
  0x23   :  { %377 = vperm.xlu2 %1531, %v53_v16  }
  0x27   :  { %1508 = vmatmul.msk.f32.vlgmr.msra.gmra.mxu3 %vm98_vm1, %v41_v10 }
  0x2b   :  { %1535 = vset.pattern.permute.xlu2 %v1612_v13 }
  0x2c   :  { %392 = vperm.xlu2 %1535, %v53_v16  }
  0x34   :  { %352 = vperm.xlu2 %1535, %v52_v21  }
  0x3c   :  { %1539 = vset.pattern.permute.xlu2 %v1611_v12 }
  0x6c   :  { %v266_v29 = vpop.permute.xlu2 %265 }
  0x75   :  { %v289_v32 = vpop.permute.xlu2 %288 }
  0x76   :  { %v291_v54 = vperm.slane %v289_v32, 0 }
  0x7d   :  { %v378_v46 = vpop.permute.xlu2 %377 }
  0x7e   :  { %v380_v7 = vperm.slane %v378_v46, 0 }
  0x86   :  { %v246_v17 = vpop.f32.mrf.mxu1  ;;  %v393_v4 = vpop.permute.xlu2 %392 }
  0x87   :  { %253 = vrot.lane.b32.xlu1 %v246_v17, %s1614_s10  ;;  %v395_v8 = vperm.slane %v393_v4, 0 }
  0x8a   :  { %v126_v18 = vpop.f32.mrf.mxu3  ;;  %v146_v19 = vpop.f32.mrf.mxu2 }
  0x8b   :  { %150 = vrot.lane.b32.xlu0 %v146_v19, %s1615_s11 }
  0x92   :  { %v201_v20 = vpop.f32.mrf.mxu3 }
  0x93   :  { %154 = vrot.lane.b32.xlu0 %v126_v18, %s1615_s11  ;;  %v181_v23 = vpop.f32.mrf.mxu2 }
  0x9a   :  { %v226_v22 = vpop.f32.mrf.mxu3 }
  0x9b   :  { %281 = vperm.xlu0 %1532, %v51_v14   ;;  %251 = vrot.lane.b32.xlu1 %v226_v22, %s1614_s10  ;;  %v445_v25 = vpop.f32.mrf.mxu2 }
  0xa2   :  { %v465_v26 = vpop.f32.mrf.mxu3 }
  0xa3   :  { %1536 = vset.pattern.permute.xlu0 %v1613_v15  ;;  %303 = vperm.xlu1 %1533, %v51_v14   ;;  %v544_v27 = vpop.f32.mrf.mxu2 }
  0xa4   :  { %337 = vperm.xlu0 %1536, %v52_v21   ;;  %469 = vrot.lane.b32.xlu2 %v465_v26, %s1615_s11 }
  0xaa   :  { %v564_v28 = vpop.f32.mrf.mxu3 }
  0xab   :  { %1534 = vset.pattern.permute.xlu1 %v1611_v12 }
  0xac   :  { %370 = vperm.xlu1 %1534, %v53_v16   ;;  %473 = vrot.lane.b32.xlu0 %v445_v25, %s1615_s11 }
  0xad   :  { %571 = vrot.lane.b32.xlu2 %v564_v28, %s1614_s10  ;;  %1537 = vset.pattern.permute.xlu0 %v1616_v36  ;;  %v353_v36 = vpop.permute.xlu2 %352 }
  0xb4   :  { %330 = vperm.xlu1 %1534, %v52_v21  }
  0xbc   :  { %569 = vrot.lane.b32.xlu1 %v544_v27, %s1614_s10 }
  0xbd   :  { %1538 = vset.pattern.permute.xlu1 %v1617_v37 }
  0xf9   :  { %v254_v31 = vpop.permute.xlu1 %253 }
  0xfd   :  { %v151_v30 = vpop.permute.xlu0 %150 }
  0xfe   :  { %v470_v37 = vpop.permute.xlu2 %469 }
 0x105   :  { %v155_v33 = vpop.permute.xlu0 %154 }
 0x106   :  { %v157_v34 = vsel %vm156_vm2, %v155_v33, %v151_v30  ;;  %v160_v35 = vsel %vm156_vm2, %v151_v30, %v155_v33  ;;  %v42_v33 = vld [vmem:[%s2198_s2] sm:$0x7] }
 0x107   :  { %v204_v38 = vadd.f32 %v181_v23, %v160_v35  ;;  %v205_v39 = vadd.f32 %v201_v20, %v157_v34  ;;  %v44_v34 = vld [vmem:[%s2198_s2 + $0x8] sm:$0x7]  ;;  %v43_v35 = vld [vmem:[%s2198_s2 + $0x4] sm:$0x7] }
 0x10d   :  { %v252_v40 = vpop.permute.xlu1 %251  ;;  %v282_v53 = vpop.permute.xlu0 %281 }
 0x10e   :  { %v256_v42 = vsel %vm255_vm3, %v252_v40, %v254_v31  ;;  %v260_v43 = vsel %vm255_vm3, %v254_v31, %v252_v40  ;;  %v284_v57 = vperm.slane %v282_v53, 0  ;;  %v572_v40 = vpop.permute.xlu2 %571 }
 0x10f   :  { %v261_v44 = vadd.f32 %v256_v42, %v204_v38  ;;  %v262_v45 = vadd.f32 %v260_v43, %v205_v39 }
 0x111   :  { %v268_v49 = vadd.f32 %v266_v29, %v261_v44  ;;  %v269_v50 = vadd.f32 %v266_v29, %v262_v45  ;;  %v1824_v44 = vld [vmem:[%s2199_s3 + $0x3] sm:$0x1] }
 0x113   :  { %v270_v51 = vmax.f32 %v268_v49, 0.0  ;;  %v271_v52 = vmax.f32 %v269_v50, 0.0  ;;  %v355_v49 = vperm.slane %v353_v36, 0 }
 0x115   :  { %v1778_v55 = vmul.f32 %v1773_v47, %v270_v51  ;;  %v1781_v56 = vmul.f32 %v1775_v48, %v271_v52  ;;  %v304_v58 = vpop.permute.xlu1 %303 }
 0x116   :  { %v306_v59 = vperm.slane %v304_v58, 0  ;;  %v338_v39 = vpop.permute.xlu0 %337 }
 0x117   :  { %v292_v60 = vmul.f32 %v291_v54, %v1778_v55  ;;  %v293_v61 = vmul.f32 %v291_v54, %v1781_v56  ;;  %v285_v0 = vmul.f32 %v284_v57, %v1778_v55  ;;  %v286_v1 = vmul.f32 %v284_v57, %v1781_v56 }
 0x118   :  { %v307_v62 = vmul.f32 %v306_v59, %v1778_v55  ;;  %v308_v63 = vmul.f32 %v306_v59, %v1781_v56  ;;  %v381_v14 = vmul.f32 %v380_v7, %v1778_v55  ;;  %v382_v16 = vmul.f32 %v380_v7, %v1781_v56 }
 0x119   :  { %v296_v2 = vrot.slane %v292_v60, 1  ;;  %v297_v3 = vrot.slane %v293_v61, 1  ;;  %v396_v21 = vmul.f32 %v395_v8, %v1778_v55  ;;  %v397_v22 = vmul.f32 %v395_v8, %v1781_v56 }
 0x11a   :  { %v311_v5 = vrot.slane %v307_v62, 2  ;;  %v312_v6 = vrot.slane %v308_v63, 2  ;;  %v385_v23 = vrot.slane %v381_v14, 1  ;;  %v386_v26 = vrot.slane %v382_v16, 1 }
 0x11b   :  { %v300_v9 = vadd.f32 %v296_v2, %v285_v0  ;;  %v301_v10 = vadd.f32 %v297_v3, %v286_v1  ;;  %v400_v29 = vrot.slane %v396_v21, 2  ;;  %v401_v30 = vrot.slane %v397_v22, 2  ;;  %v499_v3 = vpop.f32.mrf.mxu0 }
 0x11c   :  { %v340_v42 = vperm.slane %v338_v39, 0  ;;  %v356_v57 = vmul.f32 %v355_v49, %v1778_v55  ;;  %v357_v58 = vmul.f32 %v355_v49, %v1781_v56 }
 0x11d   :  { %v315_v17 = vadd.f32 %v311_v5, %v300_v9  ;;  %v316_v18 = vadd.f32 %v312_v6, %v301_v10  ;;  %v519_v6 = vpop.f32.mrf.mxu1 }
 0x11e   :  { %v371_v19 = vpop.permute.xlu1 %370  ;;  %v474_v45 = vpop.permute.xlu0 %473  ;;  %v341_v50 = vmul.f32 %v340_v42, %v1778_v55  ;;  %v342_v51 = vmul.f32 %v340_v42, %v1781_v56  ;;  %v360_v1 = vrot.slane %v356_v57, 2  ;;  %v361_v2 = vrot.slane %v357_v58, 2 }
 0x11f   :  { %v373_v20 = vperm.slane %v371_v19, 0  ;;  %322 = vrot.lane.b32.xlu2 %v315_v17, %s1615_s11  ;;  %318 = vrot.lane.b32.xlu1 %v316_v18, %s1615_s11  ;;  %v478_v4 = vsel %vm156_vm2, %v470_v37, %v474_v45  ;;  %v475_v5 = vsel %vm156_vm2, %v474_v45, %v470_v37 }
 0x120   :  { %v345_v59 = vrot.slane %v341_v50, 1  ;;  %v346_v60 = vrot.slane %v342_v51, 1  ;;  %v522_v16 = vadd.f32 %v499_v3, %v478_v4  ;;  %v523_v17 = vadd.f32 %v519_v6, %v475_v5 }
 0x121   :  { %v374_v24 = vmul.f32 %v373_v20, %v1778_v55  ;;  %v375_v25 = vmul.f32 %v373_v20, %v1781_v56  ;;  %v1843_v20 = vld [vmem:[%s2199_s3 + $0x5] sm:$0x1] }
 0x123   :  { %v389_v27 = vadd.f32 %v385_v23, %v374_v24  ;;  %v390_v28 = vadd.f32 %v386_v26, %v375_v25 }
 0x125   :  { %v404_v31 = vadd.f32 %v400_v29, %v389_v27  ;;  %v405_v32 = vadd.f32 %v401_v30, %v390_v28 }
 0x126   :  { %v331_v38 = vpop.permute.xlu1 %330 }
 0x127   :  { %408 = vrot.lane.b32.xlu0 %v404_v31, %s1614_s10  ;;  %410 = vrot.lane.b32.xlu1 %v405_v32, %s1614_s10  ;;  %v333_v43 = vperm.slane %v331_v38, 0 }
 0x128   :  { %596 = vperm.xlu2 %1539, %v42_v33  }
 0x129   :  { %v334_v53 = vmul.f32 %v333_v43, %v1778_v55  ;;  %v335_v54 = vmul.f32 %v333_v43, %v1781_v56 }
 0x12b   :  { %v349_v61 = vadd.f32 %v345_v59, %v334_v53  ;;  %v350_v62 = vadd.f32 %v346_v60, %v335_v54 }
 0x12d   :  { %v364_v8 = vadd.f32 %v360_v1, %v349_v61  ;;  %v365_v9 = vadd.f32 %v361_v2, %v350_v62 }
 0x12e   :  { %v570_v41 = vpop.permute.xlu1 %569 }
 0x12f   :  { %420 = vperm.xlu0 %1537, %v1733_v11   ;;  %581 = vperm.xlu1 %1538, %v1733_v11   ;;  %v573_v21 = vsel %vm255_vm3, %v570_v41, %v572_v40  ;;  %v577_v22 = vsel %vm255_vm3, %v572_v40, %v570_v41 }
 0x130   :  { %1541 = vset.pattern.permute.xlu2 %v1612_v13  ;;  %v578_v27 = vadd.f32 %v573_v21, %v522_v16  ;;  %v579_v28 = vadd.f32 %v577_v22, %v523_v17 }
 0x131   :  { %614 = vperm.xlu2 %1541, %v42_v33  }
 0x137   :  { %1542 = vset.pattern.permute.xlu0 %v1611_v12  ;;  %1540 = vset.pattern.permute.xlu1 %v1613_v15 }
 0x138   :  { %662 = vperm.xlu0 %1542, %v44_v34   ;;  %604 = vperm.xlu1 %1540, %v42_v33  }
 0x139   :  { %676 = vperm.xlu2 %1541, %v44_v34  }
 0x140   :  { %1545 = vset.pattern.permute.xlu0 %v1612_v13  ;;  %668 = vperm.xlu1 %1540, %v44_v34  }
 0x141   :  { %651 = vperm.xlu0 %1545, %v43_v35   ;;  %1544 = vset.pattern.permute.xlu2 %v1613_v15 }
 0x142   :  { %643 = vperm.xlu2 %1544, %v43_v35  }
 0x148   :  { %1543 = vset.pattern.permute.xlu1 %v1611_v12 }
 0x149   :  { %637 = vperm.xlu1 %1543, %v43_v35   ;;  %1546 = vset.pattern.permute.xlu0 %v1613_v15 }
 0x14a   :  { %698 = vperm.xlu0 %1546, %v1733_v11   ;;  %1548 = vset.pattern.permute.xlu2 %v1611_v12 }
 0x151   :  { %1547 = vset.pattern.permute.xlu1 %v1613_v15 }
 0x152   :  { %1551 = vset.pattern.permute.xlu0 %v1611_v12  ;;  %716 = vperm.xlu1 %1547, %v1824_v44  }
 0x153   :  { %798 = vperm.xlu0 %1551, %v1843_v20  }
 0x15a   :  { %1549 = vset.pattern.permute.xlu1 %v1612_v13 }
 0x15b   :  { %1556 = vset.pattern.permute.xlu0 %v1613_v15 }
 0x179   :  { %v323_v52 = vpop.permute.xlu2 %322 }
 0x182   :  { %v597_v7 = vpop.permute.xlu2 %596 }
 0x18b   :  { %v615_v35 = vpop.permute.xlu2 %614 }
 0x191   :  { %v319_v46 = vpop.permute.xlu1 %318 }
 0x192   :  { %v324_v55 = vsel %vm156_vm2, %v323_v52, %v319_v46  ;;  %v327_v56 = vsel %vm156_vm2, %v319_v46, %v323_v52 }
 0x193   :  { %v366_v18 = vadd.f32 %v364_v8, %v327_v56  ;;  %v367_v19 = vadd.f32 %v365_v9, %v324_v55  ;;  %v677_v54 = vpop.permute.xlu2 %676 }
 0x199   :  { %v409_v63 = vpop.permute.xlu0 %408  ;;  %v411_v0 = vpop.permute.xlu1 %410 }
 0x19a   :  { %v412_v10 = vsel %vm255_vm3, %v409_v63, %v411_v0  ;;  %v416_v14 = vsel %vm255_vm3, %v411_v0, %v409_v63 }
 0x19b   :  { %v417_v23 = vadd.f32 %v412_v10, %v366_v18  ;;  %v418_v24 = vadd.f32 %v416_v14, %v367_v19 }
 0x19c   :  { %v644_v9 = vpop.permute.xlu2 %643 }
 0x1a1   :  { %v421_v25 = vpop.permute.xlu0 %420  ;;  %v582_v26 = vpop.permute.xlu1 %581 }
 0x1a2   :  { %v423_v29 = vadd.f32 %v421_v25, %v417_v23  ;;  %v424_v30 = vadd.f32 %v421_v25, %v418_v24  ;;  %v584_v33 = vadd.f32 %v582_v26, %v578_v27  ;;  %v585_v34 = vadd.f32 %v582_v26, %v579_v28 }
 0x1a4   :  { %v586_v31 = vperm.slane %v423_v29, 0  ;;  %v587_v32 = vperm.slane %v424_v30, 0  ;;  %v55_v29 = vld [vmem:[%s2199_s3 + $0x4] sm:$0x1] }
 0x1a6   :  { %v588_v36 = vadd.f32 %v586_v31, %v584_v33  ;;  %v589_v37 = vadd.f32 %v587_v32, %v585_v34  ;;  %v1620_v33 = vmov 5  }
 0x1a8   :  { %v590_v38 = vmax.f32 %v588_v36, 0.0  ;;  %v591_v39 = vmax.f32 %v589_v37, 0.0 }
 0x1aa   :  { %v1850_v40 = vmul.f32 %v590_v38, %v1773_v47  ;;  %v1853_v41 = vmul.f32 %v591_v39, %v1775_v48  ;;  %v605_v42 = vpop.permute.xlu1 %604  ;;  %v663_v61 = vpop.permute.xlu0 %662 }
 0x1ac   :  { %v599_v43 = vperm.slane %v1850_v40, 0  ;;  %v600_v45 = vperm.slane %v1853_v41, 0  ;;  %v617_v46 = vperm.slane %v1850_v40, 2  ;;  %v618_v49 = vperm.slane %v1853_v41, 2 }
 0x1ad   :  { %v607_v50 = vperm.slane %v1850_v40, 1  ;;  %v608_v51 = vperm.slane %v1853_v41, 1 }
 0x1ae   :  { %v601_v52 = vmul.f32 %v599_v43, %v597_v7  ;;  %v602_v53 = vmul.f32 %v600_v45, %v597_v7  ;;  %v620_v62 = vmul.f32 %v618_v49, %v615_v35  ;;  %v619_v63 = vmul.f32 %v617_v46, %v615_v35 }
 0x1af   :  { %v609_v57 = vmul.f32 %v607_v50, %v605_v42  ;;  %v610_v58 = vmul.f32 %v608_v51, %v605_v42  ;;  %v665_v5 = vmul.f32 %v663_v61, %v599_v43  ;;  %v666_v6 = vmul.f32 %v663_v61, %v600_v45 }
 0x1b0   :  { %v679_v7 = vmul.f32 %v677_v54, %v617_v46  ;;  %v680_v8 = vmul.f32 %v677_v54, %v618_v49  ;;  %v646_v18 = vmul.f32 %v644_v9, %v607_v50  ;;  %v647_v19 = vmul.f32 %v644_v9, %v608_v51 }
 0x1b1   :  { %v611_v59 = vadd.f32 %v609_v57, %v601_v52  ;;  %v612_v60 = vadd.f32 %v610_v58, %v602_v53 }
 0x1b2   :  { %v669_v0 = vpop.permute.xlu1 %668 }
 0x1b3   :  { %v671_v1 = vmul.f32 %v669_v0, %v607_v50  ;;  %v672_v2 = vmul.f32 %v669_v0, %v608_v51  ;;  %v622_v3 = vadd.f32 %v620_v62, %v612_v60  ;;  %v621_v4 = vadd.f32 %v619_v63, %v611_v59  ;;  %v652_v10 = vpop.permute.xlu0 %651 }
 0x1b4   :  { %v654_v23 = vmul.f32 %v652_v10, %v617_v46  ;;  %v655_v24 = vmul.f32 %v652_v10, %v618_v49 }
 0x1b5   :  { %624 = vrot.lane.b32.xlu1 %v622_v3, %s1618_s25  ;;  %628 = vrot.lane.b32.xlu2 %v621_v4, %s1618_s25  ;;  %v673_v55 = vadd.f32 %v671_v1, %v665_v5  ;;  %v674_v56 = vadd.f32 %v672_v2, %v666_v6 }
 0x1b7   :  { %v682_v16 = vadd.f32 %v680_v8, %v674_v56  ;;  %v681_v17 = vadd.f32 %v679_v7, %v673_v55 }
 0x1bb   :  { %v638_v14 = vpop.permute.xlu1 %637 }
 0x1bc   :  { %v640_v21 = vmul.f32 %v638_v14, %v599_v43  ;;  %v641_v22 = vmul.f32 %v638_v14, %v600_v45  ;;  %v699_v43 = vpop.permute.xlu0 %698 }
 0x1bd   :  { %687 = vrot.lane.b32.xlu2 %v682_v16, %s1619_s26  ;;  %685 = vrot.lane.b32.xlu1 %v681_v17, %s1619_s26 }
 0x1be   :  { %v648_v25 = vadd.f32 %v646_v18, %v640_v21  ;;  %v649_v26 = vadd.f32 %v647_v19, %v641_v22 }
 0x1c0   :  { %v656_v27 = vadd.f32 %v654_v23, %v648_v25  ;;  %v657_v28 = vadd.f32 %v655_v24, %v649_v26 }
 0x1c4   :  { %v717_v30 = vpop.permute.xlu1 %716 }
 0x1c5   :  { %709 = vperm.xlu2 %1548, %v1824_v44   ;;  %731 = vperm.xlu1 %1549, %v1824_v44   ;;  %v719_v61 = vperm.slane %v717_v30, 0  ;;  %v799_v63 = vpop.permute.xlu0 %798 }
 0x1c6   :  { %v801_v4 = vperm.slane %v799_v63, 0 }
 0x1cd   :  { %1550 = vset.pattern.permute.xlu2 %v1613_v15  ;;  %820 = vperm.xlu1 %1549, %v1843_v20  }
 0x1ce   :  { %805 = vperm.xlu2 %1550, %v1843_v20  }
 0x1d5   :  { %1552 = vset.pattern.permute.xlu1 %v1611_v12 }
 0x1d6   :  { %765 = vperm.xlu2 %1550, %v55_v29   ;;  %758 = vperm.xlu1 %1552, %v55_v29  }
 0x1de   :  { %1553 = vset.pattern.permute.xlu2 %v1612_v13  ;;  %1554 = vset.pattern.permute.xlu1 %v1620_v33  ;;  %v45_v33 = vld [vmem:[%s2198_s2 + $0xc] sm:$0x7] }
 0x1df   :  { %780 = vperm.xlu2 %1553, %v55_v29  }
 0x1e7   :  { %1555 = vset.pattern.permute.xlu2 %v1611_v12 }
 0x20f   :  { %v629_v44 = vpop.permute.xlu2 %628 }
 0x217   :  { %v688_v31 = vpop.permute.xlu2 %687 }
 0x21f   :  { %v710_v20 = vpop.permute.xlu2 %709 }
 0x220   :  { %v712_v62 = vperm.slane %v710_v20, 0  ;;  %v47_v20 = vld [vmem:[%s2198_s2 + $0x14] sm:$0x7] }
 0x227   :  { %v625_v32 = vpop.permute.xlu1 %624 }
 0x228   :  { %v631_v34 = vsel %vm630_vm4, %v629_v44, %v625_v32  ;;  %v634_v35 = vsel %vm630_vm4, %v625_v32, %v629_v44  ;;  %v806_v53 = vpop.permute.xlu2 %805 }
 0x229   :  { %v658_v36 = vadd.f32 %v656_v27, %v634_v35  ;;  %v659_v37 = vadd.f32 %v657_v28, %v631_v34  ;;  %v808_v54 = vperm.slane %v806_v53, 0  ;;  %v46_v34 = vld [vmem:[%s2198_s2 + $0x10] sm:$0x7] }
 0x22f   :  { %v686_v38 = vpop.permute.xlu1 %685 }
 0x230   :  { %v690_v39 = vsel %vm689_vm5, %v686_v38, %v688_v31  ;;  %v694_v42 = vsel %vm689_vm5, %v688_v31, %v686_v38  ;;  %v766_v35 = vpop.permute.xlu2 %765 }
 0x231   :  { %v695_v45 = vadd.f32 %v690_v39, %v658_v36  ;;  %v696_v46 = vadd.f32 %v694_v42, %v659_v37  ;;  %v768_v38 = vperm.slane %v766_v35, 0 }
 0x233   :  { %v701_v49 = vadd.f32 %v699_v43, %v695_v45  ;;  %v702_v50 = vadd.f32 %v699_v43, %v696_v46 }
 0x235   :  { %v703_v51 = vmax.f32 %v701_v49, 0.0  ;;  %v704_v52 = vmax.f32 %v702_v50, 0.0 }
 0x237   :  { %v1881_v57 = vmul.f32 %v703_v51, %v1773_v47  ;;  %v1884_v58 = vmul.f32 %v704_v52, %v1775_v48  ;;  %v732_v59 = vpop.permute.xlu1 %731 }
 0x238   :  { %v734_v60 = vperm.slane %v732_v59, 0 }
 0x239   :  { %v809_v0 = vmul.f32 %v808_v54, %v1881_v57  ;;  %v721_v3 = vmul.f32 %v719_v61, %v1884_v58  ;;  %v810_v5 = vmul.f32 %v808_v54, %v1884_v58  ;;  %v720_v6 = vmul.f32 %v719_v61, %v1881_v57  ;;  %v781_v36 = vpop.permute.xlu2 %780 }
 0x23a   :  { %v736_v1 = vmul.f32 %v734_v60, %v1884_v58  ;;  %v735_v2 = vmul.f32 %v734_v60, %v1881_v57  ;;  %v714_v8 = vmul.f32 %v712_v62, %v1884_v58  ;;  %v713_v16 = vmul.f32 %v712_v62, %v1881_v57 }
 0x23b   :  { %v813_v55 = vrot.slane %v809_v0, 1  ;;  %v725_v9 = vrot.slane %v721_v3, 1  ;;  %v724_v17 = vrot.slane %v720_v6, 1  ;;  %v802_v19 = vmul.f32 %v801_v4, %v1881_v57 }
 0x23c   :  { %v740_v56 = vrot.slane %v736_v1, 2  ;;  %v739_v10 = vrot.slane %v735_v2, 2  ;;  %v814_v24 = vrot.slane %v810_v5, 1  ;;  %v803_v29 = vmul.f32 %v801_v4, %v1884_v58 }
 0x23d   :  { %v729_v18 = vadd.f32 %v725_v9, %v714_v8  ;;  %v728_v23 = vadd.f32 %v724_v17, %v713_v16  ;;  %v817_v26 = vadd.f32 %v813_v55, %v802_v19  ;;  %v769_v42 = vmul.f32 %v768_v38, %v1881_v57 }
 0x23e   :  { %v818_v31 = vadd.f32 %v814_v24, %v803_v29  ;;  %v770_v43 = vmul.f32 %v768_v38, %v1884_v58  ;;  %v783_v45 = vperm.slane %v781_v36, 0 }
 0x23f   :  { %v821_v7 = vpop.permute.xlu1 %820  ;;  %v744_v25 = vadd.f32 %v740_v56, %v729_v18  ;;  %v743_v28 = vadd.f32 %v739_v10, %v728_v23  ;;  %v773_v51 = vrot.slane %v769_v42, 1 }
 0x240   :  { %v823_v14 = vperm.slane %v821_v7, 0  ;;  %v774_v52 = vrot.slane %v770_v43, 1  ;;  %v784_v53 = vmul.f32 %v783_v45, %v1881_v57 }
 0x241   :  { %746 = vrot.lane.b32.xlu0 %v744_v25, %s1618_s25  ;;  %750 = vrot.lane.b32.xlu1 %v743_v28, %s1618_s25  ;;  %s1626_s25 = smov 120  }
 0x242   :  { %v824_v21 = vmul.f32 %v823_v14, %v1881_v57  ;;  %v825_v22 = vmul.f32 %v823_v14, %v1884_v58  ;;  %v788_v62 = vrot.slane %v784_v53, 2 }
 0x244   :  { %v828_v27 = vrot.slane %v824_v21, 2  ;;  %v829_v44 = vrot.slane %v825_v22, 2 }
 0x246   :  { %v832_v30 = vadd.f32 %v828_v27, %v817_v26  ;;  %v833_v32 = vadd.f32 %v829_v44, %v818_v31 }
 0x248   :  { %836 = vrot.lane.b32.xlu2 %v832_v30, %s1619_s26  ;;  %v759_v37 = vpop.permute.xlu1 %758 }
 0x249   :  { %838 = vrot.lane.b32.xlu0 %v833_v32, %s1619_s26  ;;  %848 = vperm.xlu1 %1554, %v1733_v11   ;;  %v761_v39 = vperm.slane %v759_v37, 0 }
 0x24b   :  { %v762_v49 = vmul.f32 %v761_v39, %v1881_v57  ;;  %v763_v50 = vmul.f32 %v761_v39, %v1884_v58 }
 0x24d   :  { %v777_v60 = vadd.f32 %v773_v51, %v762_v49  ;;  %v778_v61 = vadd.f32 %v774_v52, %v763_v50 }
 0x24f   :  { %v792_v3 = vadd.f32 %v788_v62, %v777_v60 }
 0x250   :  { %863 = vperm.xlu2 %1555, %v45_v33  }
 0x251   :  { %871 = vperm.xlu0 %1556, %v45_v33   ;;  %1557 = vset.pattern.permute.xlu1 %v1612_v13 }
 0x252   :  { %881 = vperm.xlu1 %1557, %v45_v33  }
 0x258   :  { %929 = vperm.xlu2 %1555, %v47_v20  }
 0x259   :  { %1560 = vset.pattern.permute.xlu0 %v1611_v12 }
 0x25a   :  { %904 = vperm.xlu0 %1560, %v46_v34   ;;  %1558 = vset.pattern.permute.xlu1 %v1613_v15 }
 0x25b   :  { %935 = vperm.xlu1 %1558, %v47_v20  }
 0x260   :  { %1559 = vset.pattern.permute.xlu2 %v1612_v13 }
 0x261   :  { %943 = vperm.xlu2 %1559, %v47_v20  }
 0x262   :  { %1561 = vset.pattern.permute.xlu0 %v1613_v15 }
 0x263   :  { %910 = vperm.xlu1 %1558, %v46_v34  }
 0x269   :  { %918 = vperm.xlu2 %1559, %v46_v34  }
 0x26b   :  { %1562 = vset.pattern.permute.xlu1 %v1611_v12 }
 0x271   :  { %965 = vperm.xlu2 %1559, %v1733_v11   ;;  %v785_v11 = vmul.f32 %v783_v45, %v1884_v58 }
 0x273   :  { %v789_v63 = vrot.slane %v785_v11, 2 }
 0x275   :  { %v793_v4 = vadd.f32 %v789_v63, %v778_v61 }
 0x2a2   :  { %v837_v46 = vpop.permute.xlu2 %836 }
 0x2aa   :  { %v864_v0 = vpop.permute.xlu2 %863 }
 0x2b2   :  { %v930_v17 = vpop.permute.xlu2 %929 }
 0x2b3   :  { %v747_v54 = vpop.permute.xlu0 %746  ;;  %v751_v59 = vpop.permute.xlu1 %750 }
 0x2b4   :  { %v752_v1 = vsel %vm630_vm4, %v751_v59, %v747_v54  ;;  %v755_v2 = vsel %vm630_vm4, %v747_v54, %v751_v59 }
 0x2b5   :  { %v794_v5 = vadd.f32 %v792_v3, %v755_v2  ;;  %v795_v6 = vadd.f32 %v793_v4, %v752_v1  ;;  %v57_v1 = vld [vmem:[%s2199_s3 + $0x6] sm:$0x1] }
 0x2bb   :  { %v839_v55 = vpop.permute.xlu0 %838  ;;  %v849_v56 = vpop.permute.xlu1 %848 }
 0x2bc   :  { %v840_v57 = vsel %vm689_vm5, %v837_v46, %v839_v55  ;;  %v844_v58 = vsel %vm689_vm5, %v839_v55, %v837_v46  ;;  %v944_v32 = vpop.permute.xlu2 %943 }
 0x2bd   :  { %v845_v7 = vadd.f32 %v840_v57, %v794_v5  ;;  %v846_v8 = vadd.f32 %v844_v58, %v795_v6  ;;  %v59_v58 = vld [vmem:[%s2199_s3 + $0x8] sm:$0x1] }
 0x2bf   :  { %v851_v9 = vadd.f32 %v849_v56, %v845_v7  ;;  %v852_v10 = vadd.f32 %v849_v56, %v846_v8  ;;  %v58_v56 = vld [vmem:[%s2199_s3 + $0x7] sm:$0x1] }
 0x2c1   :  { %v853_v14 = vperm.slane %v851_v9, 0  ;;  %v854_v16 = vperm.slane %v852_v10, 0 }
 0x2c3   :  { %v855_v18 = vadd.f32 %v853_v14, %v1850_v40  ;;  %v856_v19 = vadd.f32 %v854_v16, %v1853_v41  ;;  %v872_v40 = vpop.permute.xlu0 %871 }
 0x2c4   :  { %v882_v23 = vpop.permute.xlu1 %881  ;;  %v919_v59 = vpop.permute.xlu2 %918 }
 0x2c5   :  { %v857_v21 = vmax.f32 %v855_v18, 0.0  ;;  %v858_v22 = vmax.f32 %v856_v19, 0.0 }
 0x2c7   :  { %v1932_v24 = vmul.f32 %v857_v21, %v1773_v47  ;;  %v1935_v25 = vmul.f32 %v858_v22, %v1775_v48  ;;  %v1623_v21 = vmov 6  }
 0x2c9   :  { %v866_v26 = vperm.slane %v1932_v24, 0  ;;  %v867_v27 = vperm.slane %v1935_v25, 0  ;;  %v884_v28 = vperm.slane %v1932_v24, 2  ;;  %v885_v29 = vperm.slane %v1935_v25, 2 }
 0x2ca   :  { %v874_v41 = vperm.slane %v1932_v24, 1  ;;  %v875_v44 = vperm.slane %v1935_v25, 1 }
 0x2cb   :  { %v868_v30 = vmul.f32 %v866_v26, %v864_v0  ;;  %v869_v31 = vmul.f32 %v867_v27, %v864_v0  ;;  %v886_v36 = vmul.f32 %v884_v28, %v882_v23  ;;  %v887_v37 = vmul.f32 %v885_v29, %v882_v23 }
 0x2cc   :  { %v876_v33 = vmul.f32 %v874_v41, %v872_v40  ;;  %v877_v20 = vmul.f32 %v875_v44, %v872_v40  ;;  %v932_v39 = vmul.f32 %v930_v17, %v866_v26  ;;  %v946_v49 = vmul.f32 %v944_v32, %v884_v28  ;;  %v905_v53 = vpop.permute.xlu0 %904  ;;  %v966_v7 = vpop.permute.xlu2 %965 }
 0x2cd   :  { %v936_v38 = vpop.permute.xlu1 %935  ;;  %v933_v51 = vmul.f32 %v930_v17, %v867_v27  ;;  %v947_v54 = vmul.f32 %v944_v32, %v885_v29  ;;  %v907_v61 = vmul.f32 %v905_v53, %v866_v26  ;;  %v908_v62 = vmul.f32 %v905_v53, %v867_v27 }
 0x2ce   :  { %v878_v34 = vadd.f32 %v876_v33, %v868_v30  ;;  %v879_v35 = vadd.f32 %v877_v20, %v869_v31  ;;  %v938_v42 = vmul.f32 %v936_v38, %v874_v41  ;;  %v939_v46 = vmul.f32 %v936_v38, %v875_v44 }
 0x2cf   :  { %v921_v3 = vmul.f32 %v919_v59, %v884_v28  ;;  %v922_v4 = vmul.f32 %v919_v59, %v885_v29 }
 0x2d0   :  { %v888_v43 = vadd.f32 %v886_v36, %v878_v34  ;;  %v889_v45 = vadd.f32 %v887_v37, %v879_v35  ;;  %v940_v50 = vadd.f32 %v938_v42, %v932_v39  ;;  %v941_v11 = vadd.f32 %v939_v46, %v933_v51 }
 0x2d2   :  { %891 = vrot.lane.b32.xlu1 %v889_v45, %s1621_s13  ;;  %895 = vrot.lane.b32.xlu2 %v888_v43, %s1621_s13  ;;  %v948_v52 = vadd.f32 %v946_v49, %v940_v50  ;;  %v949_v2 = vadd.f32 %v947_v54, %v941_v11 }
 0x2d4   :  { %952 = vrot.lane.b32.xlu0 %v948_v52, %s1622_s14 }
 0x2d5   :  { %v911_v60 = vpop.permute.xlu1 %910 }
 0x2d6   :  { %v913_v63 = vmul.f32 %v911_v60, %v874_v41  ;;  %v914_v0 = vmul.f32 %v911_v60, %v875_v44 }
 0x2d8   :  { %v915_v5 = vadd.f32 %v913_v63, %v907_v61  ;;  %v916_v6 = vadd.f32 %v914_v0, %v908_v62 }
 0x2da   :  { %998 = vperm.xlu2 %1559, %v57_v1   ;;  %954 = vrot.lane.b32.xlu1 %v949_v2, %s1622_s14  ;;  %v923_v55 = vadd.f32 %v921_v3, %v915_v5  ;;  %v924_v57 = vadd.f32 %v922_v4, %v916_v6 }
 0x2dc   :  { %983 = vperm.xlu0 %1561, %v57_v1  }
 0x2e2   :  { %976 = vperm.xlu1 %1562, %v57_v1   ;;  %1564 = vset.pattern.permute.xlu2 %v1611_v12 }
 0x2e3   :  { %1065 = vperm.xlu2 %1564, %v59_v58  }
 0x2e4   :  { %1565 = vset.pattern.permute.xlu0 %v1612_v13 }
 0x2e5   :  { %1087 = vperm.xlu0 %1565, %v59_v58  }
 0x2ea   :  { %1563 = vset.pattern.permute.xlu1 %v1613_v15 }
 0x2eb   :  { %1072 = vperm.xlu1 %1563, %v59_v58   ;;  %1025 = vperm.xlu2 %1564, %v58_v56  }
 0x2ed   :  { %1567 = vset.pattern.permute.xlu0 %v1623_v21 }
 0x2f3   :  { %1032 = vperm.xlu1 %1563, %v58_v56   ;;  %1569 = vset.pattern.permute.xlu2 %v1613_v15 }
 0x2fb   :  { %1566 = vset.pattern.permute.xlu1 %v1612_v13 }
 0x2fc   :  { %1047 = vperm.xlu1 %1566, %v58_v56  }
 0x304   :  { %1568 = vset.pattern.permute.xlu1 %v1611_v12 }
 0x32c   :  { %v896_v10 = vpop.permute.xlu2 %895 }
 0x334   :  { %v999_v31 = vpop.permute.xlu2 %998 }
 0x335   :  { %v1001_v35 = vperm.slane %v999_v31, 0 }
 0x33d   :  { %v1066_v60 = vpop.permute.xlu2 %1065 }
 0x33e   :  { %v1068_v62 = vperm.slane %v1066_v60, 0 }
 0x344   :  { %v892_v8 = vpop.permute.xlu1 %891 }
 0x345   :  { %v898_v14 = vsel %vm897_vm6, %v896_v10, %v892_v8  ;;  %v901_v16 = vsel %vm897_vm6, %v892_v8, %v896_v10  ;;  %v1989_v10 = vld [vmem:[%s2201_s5] sm:$0x7] }
 0x346   :  { %v953_v9 = vpop.permute.xlu0 %952  ;;  %v925_v17 = vadd.f32 %v923_v55, %v901_v16  ;;  %v926_v18 = vadd.f32 %v924_v57, %v898_v14  ;;  %v50_v14 = vld [vmem:[%s2198_s2 + $0x20] sm:$0x7]  ;;  %v48_v16 = vld [vmem:[%s2198_s2 + $0x18] sm:$0x7] }
 0x34c   :  { %v955_v19 = vpop.permute.xlu1 %954 }
 0x34d   :  { %v957_v22 = vsel %vm956_vm7, %v953_v9, %v955_v19  ;;  %v961_v23 = vsel %vm956_vm7, %v955_v19, %v953_v9  ;;  %v1026_v19 = vpop.permute.xlu2 %1025 }
 0x34e   :  { %v962_v26 = vadd.f32 %v957_v22, %v925_v17  ;;  %v963_v27 = vadd.f32 %v961_v23, %v926_v18  ;;  %v984_v28 = vpop.permute.xlu0 %983  ;;  %v49_v17 = vld [vmem:[%s2198_s2 + $0x1c] sm:$0x7]  ;;  %s1625_s2 = smov 8  }
 0x34f   :  { %v986_v30 = vperm.slane %v984_v28, 0 }
 0x350   :  { %v968_v29 = vadd.f32 %v966_v7, %v962_v26  ;;  %v969_v40 = vadd.f32 %v966_v7, %v963_v27 }
 0x352   :  { %v970_v41 = vmax.f32 %v968_v29, 0.0  ;;  %v971_v44 = vmax.f32 %v969_v40, 0.0  ;;  %v1028_v29 = vperm.slane %v1026_v19, 0 }
 0x354   :  { %v1967_v32 = vmul.f32 %v970_v41, %v1773_v47  ;;  %v1970_v33 = vmul.f32 %v971_v44, %v1775_v48  ;;  %v977_v20 = vpop.permute.xlu1 %976 }
 0x355   :  { %v979_v34 = vperm.slane %v977_v20, 0 }
 0x356   :  { %v987_v36 = vmul.f32 %v986_v30, %v1967_v32  ;;  %v988_v37 = vmul.f32 %v986_v30, %v1970_v33  ;;  %v1003_v45 = vmul.f32 %v1001_v35, %v1970_v33  ;;  %v1002_v46 = vmul.f32 %v1001_v35, %v1967_v32 }
 0x357   :  { %v980_v38 = vmul.f32 %v979_v34, %v1967_v32  ;;  %v981_v39 = vmul.f32 %v979_v34, %v1970_v33  ;;  %v1088_v49 = vpop.permute.xlu0 %1087  ;;  %v1069_v4 = vmul.f32 %v1068_v62, %v1967_v32  ;;  %v1070_v5 = vmul.f32 %v1068_v62, %v1970_v33 }
 0x358   :  { %v991_v42 = vrot.slane %v987_v36, 1  ;;  %v992_v43 = vrot.slane %v988_v37, 1  ;;  %v1007_v52 = vrot.slane %v1003_v45, 2  ;;  %v1006_v53 = vrot.slane %v1002_v46, 2 }
 0x359   :  { %v1090_v11 = vperm.slane %v1088_v49, 0  ;;  %v1029_v20 = vmul.f32 %v1028_v29, %v1967_v32  ;;  %v1030_v34 = vmul.f32 %v1028_v29, %v1970_v33  ;;  %v1624_v45 = vmov 3  }
 0x35a   :  { %v995_v50 = vadd.f32 %v991_v42, %v980_v38  ;;  %v996_v51 = vadd.f32 %v992_v43, %v981_v39 }
 0x35b   :  { %v1091_v0 = vmul.f32 %v1090_v11, %v1967_v32  ;;  %v1092_v1 = vmul.f32 %v1090_v11, %v1970_v33 }
 0x35c   :  { %v1011_v54 = vadd.f32 %v1007_v52, %v996_v51  ;;  %v1010_v59 = vadd.f32 %v1006_v53, %v995_v50 }
 0x35d   :  { %v1073_v61 = vpop.permute.xlu1 %1072  ;;  %v1095_v57 = vrot.slane %v1091_v0, 2  ;;  %v1096_v58 = vrot.slane %v1092_v1, 2 }
 0x35e   :  { %v1075_v63 = vperm.slane %v1073_v61, 0  ;;  %1013 = vrot.lane.b32.xlu2 %v1011_v54, %s1621_s13  ;;  %1017 = vrot.lane.b32.xlu0 %v1010_v59, %s1621_s13 }
 0x360   :  { %v1076_v2 = vmul.f32 %v1075_v63, %v1967_v32  ;;  %v1077_v3 = vmul.f32 %v1075_v63, %v1970_v33 }
 0x362   :  { %v1080_v6 = vrot.slane %v1076_v2, 1  ;;  %v1081_v55 = vrot.slane %v1077_v3, 1 }
 0x364   :  { %v1084_v56 = vadd.f32 %v1080_v6, %v1069_v4  ;;  %v1085_v7 = vadd.f32 %v1081_v55, %v1070_v5 }
 0x365   :  { %v1033_v18 = vpop.permute.xlu1 %1032 }
 0x366   :  { %v1100_v8 = vadd.f32 %v1096_v58, %v1085_v7  ;;  %v1099_v9 = vadd.f32 %v1095_v57, %v1084_v56  ;;  %1115 = vperm.xlu0 %1567, %v1989_v10   ;;  %v1035_v22 = vperm.slane %v1033_v18, 0 }
 0x368   :  { %1105 = vrot.lane.b32.xlu2 %v1100_v8, %s1622_s14  ;;  %1103 = vrot.lane.b32.xlu1 %v1099_v9, %s1622_s14  ;;  %v1036_v26 = vmul.f32 %v1035_v22, %v1967_v32  ;;  %v1037_v27 = vmul.f32 %v1035_v22, %v1970_v33 }
 0x36a   :  { %v1040_v44 = vrot.slane %v1036_v26, 1  ;;  %v1041_v30 = vrot.slane %v1037_v27, 1 }
 0x36c   :  { %v1044_v37 = vadd.f32 %v1040_v44, %v1029_v20  ;;  %v1045_v38 = vadd.f32 %v1041_v30, %v1030_v34 }
 0x36e   :  { %1572 = vset.pattern.permute.xlu0 %v1613_v15  ;;  %v1048_v21 = vpop.permute.xlu1 %1047 }
 0x36f   :  { %1202 = vperm.xlu0 %1572, %v50_v14   ;;  %v1050_v23 = vperm.slane %v1048_v21, 0 }
 0x370   :  { %1130 = vperm.xlu1 %1568, %v48_v16   ;;  %1138 = vperm.xlu2 %1569, %v48_v16  }
 0x371   :  { %v1051_v40 = vmul.f32 %v1050_v23, %v1967_v32  ;;  %v1052_v41 = vmul.f32 %v1050_v23, %v1970_v33 }
 0x373   :  { %v1055_v35 = vrot.slane %v1051_v40, 2  ;;  %v1056_v36 = vrot.slane %v1052_v41, 2 }
 0x375   :  { %v1059_v46 = vadd.f32 %v1055_v35, %v1044_v37  ;;  %v1060_v49 = vadd.f32 %v1056_v36, %v1045_v38 }
 0x377   :  { %1577 = vset.pattern.permute.xlu0 %v1611_v12 }
 0x378   :  { %1570 = vset.pattern.permute.xlu1 %v1612_v13  ;;  %1571 = vset.pattern.permute.xlu2 %v1611_v12 }
 0x379   :  { %1148 = vperm.xlu1 %1570, %v48_v16   ;;  %1196 = vperm.xlu2 %1571, %v50_v14  }
 0x381   :  { %1210 = vperm.xlu1 %1570, %v50_v14   ;;  %1171 = vperm.xlu2 %1571, %v49_v17  }
 0x389   :  { %1573 = vset.pattern.permute.xlu1 %v1613_v15  ;;  %1574 = vset.pattern.permute.xlu2 %v1612_v13 }
 0x38a   :  { %1177 = vperm.xlu1 %1573, %v49_v17   ;;  %1185 = vperm.xlu2 %1574, %v49_v17  }
 0x392   :  { %1576 = vset.pattern.permute.xlu2 %v1613_v15  ;;  %1575 = vset.pattern.permute.xlu1 %v1624_v45 }
 0x3b8   :  { %v1014_v28 = vpop.permute.xlu2 %1013 }
 0x3c2   :  { %v1106_v39 = vpop.permute.xlu2 %1105 }
 0x3ca   :  { %v1139_v59 = vpop.permute.xlu2 %1138 }
 0x3d0   :  { %v1018_v31 = vpop.permute.xlu0 %1017 }
 0x3d1   :  { %v1019_v42 = vsel %vm897_vm6, %v1018_v31, %v1014_v28  ;;  %v1022_v43 = vsel %vm897_vm6, %v1014_v28, %v1018_v31 }
 0x3d2   :  { %v1061_v50 = vadd.f32 %v1059_v46, %v1022_v43  ;;  %v1062_v51 = vadd.f32 %v1060_v49, %v1019_v42  ;;  %v60_v49 = vld [vmem:[%s2199_s3 + $0x9] sm:$0x1] }
 0x3d3   :  { %v1197_v55 = vpop.permute.xlu2 %1196 }
 0x3d8   :  { %v1116_v53 = vpop.permute.xlu0 %1115 }
 0x3da   :  { %v1104_v52 = vpop.permute.xlu1 %1103 }
 0x3db   :  { %v1107_v32 = vsel %vm956_vm7, %v1104_v52, %v1106_v39  ;;  %v1111_v33 = vsel %vm956_vm7, %v1106_v39, %v1104_v52  ;;  %v1172_v44 = vpop.permute.xlu2 %1171 }
 0x3dc   :  { %v1112_v11 = vadd.f32 %v1107_v32, %v1061_v50  ;;  %v1113_v54 = vadd.f32 %v1111_v33, %v1062_v51 }
 0x3de   :  { %v1118_v60 = vadd.f32 %v1116_v53, %v1112_v11  ;;  %v1119_v61 = vadd.f32 %v1116_v53, %v1113_v54  ;;  %v62_v11 = vld [vmem:[%s2199_s3 + $0xb] sm:$0x1]  ;;  %v61_v54 = vld [vmem:[%s2199_s3 + $0xa] sm:$0x1] }
 0x3e0   :  { %v1120_v62 = vperm.slane %v1118_v60, 0  ;;  %v1121_v63 = vperm.slane %v1119_v61, 0 }
 0x3e1   :  { %v1203_v21 = vpop.permute.xlu0 %1202 }
 0x3e2   :  { %v1122_v0 = vadd.f32 %v1120_v62, %v1932_v24  ;;  %v1123_v1 = vadd.f32 %v1121_v63, %v1935_v25  ;;  %v1131_v2 = vpop.permute.xlu1 %1130 }
 0x3e4   :  { %v1124_v3 = vmax.f32 %v1122_v0, 0.0  ;;  %v1125_v4 = vmax.f32 %v1123_v1, 0.0  ;;  %v1186_v38 = vpop.permute.xlu2 %1185 }
 0x3e6   :  { %v2023_v5 = vmul.f32 %v1124_v3, %v1773_v47  ;;  %v2026_v6 = vmul.f32 %v1125_v4, %v1775_v48  ;;  %v1627_v3 = vmov 7  }
 0x3e8   :  { %v1133_v57 = vperm.slane %v2023_v5, 0  ;;  %v1134_v58 = vperm.slane %v2026_v6, 0  ;;  %v1141_v56 = vperm.slane %v2023_v5, 1  ;;  %v1142_v24 = vperm.slane %v2026_v6, 1 }
 0x3e9   :  { %v1151_v14 = vperm.slane %v2023_v5, 2  ;;  %v1152_v16 = vperm.slane %v2026_v6, 2 }
 0x3ea   :  { %v1143_v7 = vmul.f32 %v1141_v56, %v1139_v59  ;;  %v1144_v25 = vmul.f32 %v1142_v24, %v1139_v59  ;;  %v1135_v8 = vmul.f32 %v1133_v57, %v1131_v2  ;;  %v1136_v9 = vmul.f32 %v1134_v58, %v1131_v2 }
 0x3eb   :  { %v1149_v17 = vpop.permute.xlu1 %1148  ;;  %v1199_v28 = vmul.f32 %v1197_v55, %v1133_v57  ;;  %v1200_v29 = vmul.f32 %v1197_v55, %v1134_v58  ;;  %v1205_v40 = vmul.f32 %v1203_v21, %v1141_v56  ;;  %v1206_v41 = vmul.f32 %v1203_v21, %v1142_v24 }
 0x3ec   :  { %v1145_v18 = vadd.f32 %v1143_v7, %v1135_v8  ;;  %v1146_v19 = vadd.f32 %v1144_v25, %v1136_v9  ;;  %v1153_v22 = vmul.f32 %v1151_v14, %v1149_v17  ;;  %v1154_v23 = vmul.f32 %v1152_v16, %v1149_v17 }
 0x3ed   :  { %v1207_v31 = vadd.f32 %v1205_v40, %v1199_v28  ;;  %v1208_v20 = vadd.f32 %v1206_v41, %v1200_v29  ;;  %v1174_v42 = vmul.f32 %v1172_v44, %v1133_v57  ;;  %v1175_v43 = vmul.f32 %v1172_v44, %v1134_v58 }
 0x3ee   :  { %v1155_v26 = vadd.f32 %v1153_v22, %v1145_v18  ;;  %v1156_v27 = vadd.f32 %v1154_v23, %v1146_v19  ;;  %v1188_v50 = vmul.f32 %v1186_v38, %v1151_v14  ;;  %v1189_v51 = vmul.f32 %v1186_v38, %v1152_v16 }
 0x3f0   :  { %1158 = vrot.lane.b32.xlu0 %v1156_v27, %s1625_s2  ;;  %1162 = vrot.lane.b32.xlu1 %v1155_v26, %s1625_s2 }
 0x3f3   :  { %v1211_v30 = vpop.permute.xlu1 %1210 }
 0x3f4   :  { %v1213_v34 = vmul.f32 %v1211_v30, %v1151_v14  ;;  %v1214_v35 = vmul.f32 %v1211_v30, %v1152_v16 }
 0x3f6   :  { %v1215_v36 = vadd.f32 %v1213_v34, %v1207_v31  ;;  %v1216_v37 = vadd.f32 %v1214_v35, %v1208_v20 }
 0x3f8   :  { %1219 = vrot.lane.b32.xlu2 %v1215_v36, %s1626_s25  ;;  %1232 = vperm.xlu1 %1575, %v1989_v10  }
 0x3f9   :  { %1221 = vrot.lane.b32.xlu0 %v1216_v37, %s1626_s25 }
 0x3fc   :  { %v1178_v39 = vpop.permute.xlu1 %1177 }
 0x3fd   :  { %v1180_v45 = vmul.f32 %v1178_v39, %v1141_v56  ;;  %v1181_v46 = vmul.f32 %v1178_v39, %v1142_v24 }
 0x3ff   :  { %v1182_v52 = vadd.f32 %v1180_v45, %v1174_v42  ;;  %v1183_v32 = vadd.f32 %v1181_v46, %v1175_v43 }
 0x400   :  { %1250 = vperm.xlu2 %1576, %v60_v49   ;;  %1578 = vset.pattern.permute.xlu1 %v1612_v13 }
 0x401   :  { %1243 = vperm.xlu0 %1577, %v60_v49   ;;  %v1190_v33 = vadd.f32 %v1188_v50, %v1182_v52  ;;  %v1191_v53 = vadd.f32 %v1189_v51, %v1183_v32  ;;  %1265 = vperm.xlu1 %1578, %v60_v49  }
 0x408   :  { %1339 = vperm.xlu2 %1576, %v62_v11  }
 0x409   :  { %1581 = vset.pattern.permute.xlu0 %v1613_v15  ;;  %1579 = vset.pattern.permute.xlu1 %v1611_v12 }
 0x40a   :  { %1299 = vperm.xlu0 %1581, %v61_v54   ;;  %1332 = vperm.xlu1 %1579, %v62_v11  }
 0x410   :  { %1580 = vset.pattern.permute.xlu2 %v1612_v13 }
 0x411   :  { %1354 = vperm.xlu2 %1580, %v62_v11  }
 0x412   :  { %1292 = vperm.xlu1 %1579, %v61_v54  }
 0x419   :  { %1314 = vperm.xlu2 %1580, %v61_v54  }
 0x421   :  { %1582 = vset.pattern.permute.xlu2 %v1627_v3  ;;  %v93_v3 = vld [vmem:[%s2203_s7 + $0xd8] sm:$0xff] }
 0x452   :  { %v1220_v59 = vpop.permute.xlu2 %1219 }
 0x45a   :  { %v1251_v62 = vpop.permute.xlu2 %1250 }
 0x45b   :  { %v1253_v8 = vperm.slane %v1251_v62, 0  ;;  %v80_v62 = vld [vmem:[%s2203_s7 + $0x70] sm:$0xff] }
 0x462   :  { %v1159_v60 = vpop.permute.xlu0 %1158  ;;  %v1163_v61 = vpop.permute.xlu1 %1162 }
 0x463   :  { %v1165_v63 = vsel %vm1164_vm8, %v1163_v61, %v1159_v60  ;;  %v1168_v0 = vsel %vm1164_vm8, %v1159_v60, %v1163_v61  ;;  %v1340_v58 = vpop.permute.xlu2 %1339  ;;  %v81_v60 = vld [vmem:[%s2203_s7 + $0x78] sm:$0xff] }
 0x464   :  { %v1192_v15 = vadd.f32 %v1190_v33, %v1168_v0  ;;  %v1193_v1 = vadd.f32 %v1191_v53, %v1165_v63  ;;  %v1342_v31 = vperm.slane %v1340_v58, 0  ;;  %v97_v61 = vld [vmem:[%s2203_s7 + $0xf8] sm:$0xff]  ;;  %1395 = vmatpush.msrb.mxu0 %v81_v60  ;;  %v96_v63 = vld [vmem:[%s2203_s7 + $0xf0] sm:$0xff]  ;;  %v79_v0 = vld [vmem:[%s2203_s7 + $0x68] sm:$0xff] }
 0x465   :  { %1415 = vmatpush.msra.mxu1 %v97_v61  ;;  %v74_v58 = vld [vmem:[%s2203_s7 + $0x40] sm:$0xff] }
 0x466   :  { %1396 = vmatpush.msrb.mxu0 %v80_v62 }
 0x467   :  { %1416 = vmatpush.msra.mxu1 %v96_v63 }
 0x468   :  { %1397 = vmatpush.msrb.mxu0 %v79_v0 }
 0x46a   :  { %v1233_v2 = vpop.permute.xlu1 %1232 }
 0x46b   :  { %v1222_v12 = vpop.permute.xlu0 %1221  ;;  %v1355_v41 = vpop.permute.xlu2 %1354 }
 0x46c   :  { %v1224_v13 = vsel %vm1223_vm9, %v1220_v59, %v1222_v12  ;;  %v1228_v4 = vsel %vm1223_vm9, %v1222_v12, %v1220_v59  ;;  %v1357_v20 = vperm.slane %v1355_v41, 0  ;;  %v94_v12 = vld [vmem:[%s2203_s7 + $0xe0] sm:$0xff] }
 0x46d   :  { %v1229_v55 = vadd.f32 %v1224_v13, %v1192_v15  ;;  %v1230_v57 = vadd.f32 %v1228_v4, %v1193_v1  ;;  %v95_v15 = vld [vmem:[%s2203_s7 + $0xe8] sm:$0xff]  ;;  %v78_v1 = vld [vmem:[%s2203_s7 + $0x60] sm:$0xff]  ;;  %v76_v13 = vld [vmem:[%s2203_s7 + $0x50] sm:$0xff] }
 0x46e   :  { %1417 = vmatpush.msra.mxu1 %v95_v15  ;;  %1398 = vmatpush.msrb.mxu0 %v78_v1  ;;  %v92_v4 = vld [vmem:[%s2203_s7 + $0xd0] sm:$0xff]  ;;  %v82_v41 = vld [vmem:[%s2203_s7 + $0x80] sm:$0xff] }
 0x46f   :  { %v1235_v56 = vadd.f32 %v1233_v2, %v1229_v55  ;;  %v1236_v24 = vadd.f32 %v1233_v2, %v1230_v57  ;;  %v77_v2 = vld [vmem:[%s2203_s7 + $0x58] sm:$0xff]  ;;  %v75_v55 = vld [vmem:[%s2203_s7 + $0x48] sm:$0xff] }
 0x470   :  { %1418 = vmatpush.msra.mxu1 %v94_v12  ;;  %1399 = vmatpush.msrb.mxu0 %v77_v2  ;;  %v91_v57 = vld [vmem:[%s2203_s7 + $0xc8] sm:$0xff] }
 0x471   :  { %v1237_v7 = vmax.f32 %v1235_v56, 0.0  ;;  %v1238_v25 = vmax.f32 %v1236_v24, 0.0  ;;  %v90_v56 = vld [vmem:[%s2203_s7 + $0xc0] sm:$0xff]  ;;  %v73_v24 = vld [vmem:[%s2203_s7 + $0x38] sm:$0xff] }
 0x472   :  { %1419 = vmatpush.msra.mxu1 %v93_v3  ;;  %1400 = vmatpush.msrb.mxu0 %v76_v13 }
 0x473   :  { %v2057_v9 = vmul.f32 %v1237_v7, %v1773_v47  ;;  %v2060_v14 = vmul.f32 %v1238_v25, %v1775_v48  ;;  %v1244_v16 = vpop.permute.xlu0 %1243  ;;  %v1266_v18 = vpop.permute.xlu1 %1265  ;;  %v89_v7 = vld [vmem:[%s2203_s7 + $0xb8] sm:$0xff]  ;;  %v72_v25 = vld [vmem:[%s2203_s7 + $0x30] sm:$0xff] }
 0x474   :  { %v1246_v17 = vperm.slane %v1244_v16, 0  ;;  %v1268_v26 = vperm.slane %v1266_v18, 0  ;;  %1420 = vmatpush.msra.mxu1 %v92_v4  ;;  %1401 = vmatpush.msrb.mxu0 %v75_v55  ;;  %v71_v16 = vld [vmem:[%s2203_s7 + $0x28] sm:$0xff]  ;;  %v70_v18 = vld [vmem:[%s2203_s7 + $0x20] sm:$0xff] }
 0x475   :  { %v1254_v19 = vmul.f32 %v1253_v8, %v2057_v9  ;;  %v1255_v21 = vmul.f32 %v1253_v8, %v2060_v14  ;;  %v1343_v38 = vmul.f32 %v1342_v31, %v2057_v9  ;;  %v1344_v39 = vmul.f32 %v1342_v31, %v2060_v14  ;;  %v88_v8 = vld [vmem:[%s2203_s7 + $0xb0] sm:$0xff]  ;;  %v1315_v31 = vpop.permute.xlu2 %1314 }
 0x476   :  { %v1247_v22 = vmul.f32 %v1246_v17, %v2057_v9  ;;  %v1248_v23 = vmul.f32 %v1246_v17, %v2060_v14  ;;  %v1269_v29 = vmul.f32 %v1268_v26, %v2057_v9  ;;  %v1270_v40 = vmul.f32 %v1268_v26, %v2060_v14  ;;  %1421 = vmatpush.msra.mxu1 %v91_v57  ;;  %v87_v17 = vld [vmem:[%s2203_s7 + $0xa8] sm:$0xff]  ;;  %v84_v26 = vld [vmem:[%s2203_s7 + $0x90] sm:$0xff] }
 0x477   :  { %v1258_v27 = vrot.slane %v1254_v19, 1  ;;  %v1259_v28 = vrot.slane %v1255_v21, 1  ;;  %v1358_v43 = vmul.f32 %v1357_v20, %v2057_v9  ;;  %v1359_v45 = vmul.f32 %v1357_v20, %v2060_v14  ;;  %1402 = vmatpush.msrb.mxu0 %v74_v58  ;;  %v86_v19 = vld [vmem:[%s2203_s7 + $0xa0] sm:$0xff]  ;;  %v69_v21 = vld [vmem:[%s2203_s7 + $0x18] sm:$0xff] }
 0x478   :  { %v1273_v34 = vrot.slane %v1269_v29, 2  ;;  %v1274_v35 = vrot.slane %v1270_v40, 2  ;;  %v1347_v49 = vrot.slane %v1343_v38, 1  ;;  %v1348_v50 = vrot.slane %v1344_v39, 1  ;;  %1422 = vmatpush.msra.mxu1 %v90_v56  ;;  %v83_v29 = vld [vmem:[%s2203_s7 + $0x88] sm:$0xff]  ;;  %v66_v40 = vld [vmem:[%s2203_s7] sm:$0xff] }
 0x479   :  { %v1262_v44 = vadd.f32 %v1258_v27, %v1247_v22  ;;  %v1263_v30 = vadd.f32 %v1259_v28, %v1248_v23  ;;  %v1362_v32 = vrot.slane %v1358_v43, 2  ;;  %v1363_v33 = vrot.slane %v1359_v45, 2  ;;  %1403 = vmatpush.msrb.mxu0 %v73_v24  ;;  %v85_v22 = vld [vmem:[%s2203_s7 + $0x98] sm:$0xff]  ;;  %v68_v23 = vld [vmem:[%s2203_s7 + $0x10] sm:$0xff]  ;;  %v67_v27 = vld [vmem:[%s2203_s7 + $0x8] sm:$0xff] }
 0x47a   :  { %1423 = vmatpush.msra.mxu1 %v89_v7  ;;  %v1628_v24 = vmov 9  }
 0x47b   :  { %v1278_v36 = vadd.f32 %v1274_v35, %v1263_v30  ;;  %v1277_v37 = vadd.f32 %v1273_v34, %v1262_v44  ;;  %1404 = vmatpush.msrb.mxu0 %v72_v25  ;;  %v1317_v34 = vperm.slane %v1315_v31, 0  ;;  %1583 = vset.pattern.permute.xlu0 %v1628_v24 }
 0x47c   :  { %v1333_v42 = vpop.permute.xlu1 %1332  ;;  %1424 = vmatpush.msra.mxu1 %v88_v8  ;;  %v1300_v28 = vpop.permute.xlu0 %1299 }
 0x47d   :  { %1280 = vrot.lane.b32.xlu1 %v1278_v36, %s1625_s2  ;;  %1284 = vrot.lane.b32.xlu2 %v1277_v37, %s1625_s2  ;;  %v1335_v46 = vperm.slane %v1333_v42, 0  ;;  %v1302_v30 = vperm.slane %v1300_v28, 0  ;;  %v1318_v39 = vmul.f32 %v1317_v34, %v2057_v9  ;;  %v1319_v42 = vmul.f32 %v1317_v34, %v2060_v14 }
 0x47e   :  { %1405 = vmatpush.msrb.mxu0 %v71_v16  ;;  %1425 = vmatpush.msra.mxu1 %v87_v17 }
 0x47f   :  { %v1336_v51 = vmul.f32 %v1335_v46, %v2057_v9  ;;  %v1337_v52 = vmul.f32 %v1335_v46, %v2060_v14  ;;  %v1303_v35 = vmul.f32 %v1302_v30, %v2057_v9  ;;  %v1304_v36 = vmul.f32 %v1302_v30, %v2060_v14 }
 0x480   :  { %1406 = vmatpush.msrb.mxu0 %v70_v18  ;;  %1426 = vmatpush.msra.mxu1 %v86_v19 }
 0x481   :  { %v1351_v53 = vadd.f32 %v1347_v49, %v1336_v51  ;;  %v1352_v11 = vadd.f32 %v1348_v50, %v1337_v52  ;;  %v1307_v43 = vrot.slane %v1303_v35, 1  ;;  %v1308_v45 = vrot.slane %v1304_v36, 1 }
 0x482   :  { %1407 = vmatpush.msrb.mxu0 %v69_v21  ;;  %1427 = vmatpush.msra.mxu1 %v85_v22  ;;  %v1322_v52 = vrot.slane %v1318_v39, 2 }
 0x483   :  { %v1367_v54 = vadd.f32 %v1363_v33, %v1352_v11  ;;  %v1366_v59 = vadd.f32 %v1362_v32, %v1351_v53  ;;  %v1323_v32 = vrot.slane %v1319_v42, 2 }
 0x484   :  { %1408 = vmatpush.msrb.mxu0 %v68_v23  ;;  %1428 = vmatpush.msra.mxu1 %v84_v26  ;;  %v1293_v44 = vpop.permute.xlu1 %1292 }
 0x485   :  { %1372 = vrot.lane.b32.xlu1 %v1367_v54, %s1626_s25  ;;  %1370 = vrot.lane.b32.xlu0 %v1366_v59, %s1626_s25  ;;  %v1295_v20 = vperm.slane %v1293_v44, 0 }
 0x486   :  { %1382 = vperm.xlu2 %1582, %v1989_v10   ;;  %1409 = vmatpush.msrb.mxu0 %v67_v27 }
 0x487   :  { %1429 = vmatpush.msra.mxu1 %v83_v29  ;;  %v1296_v37 = vmul.f32 %v1295_v20, %v2057_v9  ;;  %v1297_v38 = vmul.f32 %v1295_v20, %v2060_v14 }
 0x488   :  { %1410 = vmatpush.msrb.mxu0 %v66_v40 }
 0x489   :  { %1430 = vmatpush.msra.mxu1 %v82_v41  ;;  %v1311_v50 = vadd.f32 %v1307_v43, %v1296_v37  ;;  %v1312_v51 = vadd.f32 %v1308_v45, %v1297_v38 }
 0x48b   :  { %v1326_v11 = vadd.f32 %v1322_v52, %v1311_v50  ;;  %v1327_v54 = vadd.f32 %v1323_v32, %v1312_v51 }
 0x48d   :  { %1436 = vperm.xlu0 %1583, %v1989_v10  }
 0x4d7   :  { %v1285_v49 = vpop.permute.xlu2 %1284 }
 0x4e0   :  { %v1383_v63 = vpop.permute.xlu2 %1382 }
 0x4ef   :  { %v1281_v46 = vpop.permute.xlu1 %1280 }
 0x4f0   :  { %v1286_v33 = vsel %vm1164_vm8, %v1285_v49, %v1281_v46  ;;  %v1289_v53 = vsel %vm1164_vm8, %v1281_v46, %v1285_v49 }
 0x4f1   :  { %v1328_v59 = vadd.f32 %v1326_v11, %v1289_v53  ;;  %v1329_v60 = vadd.f32 %v1327_v54, %v1286_v33 }
 0x4f7   :  { %v1371_v61 = vpop.permute.xlu0 %1370  ;;  %v1373_v9 = vpop.permute.xlu1 %1372 }
 0x4f8   :  { %v1374_v14 = vsel %vm1223_vm9, %v1371_v61, %v1373_v9  ;;  %v1378_v62 = vsel %vm1223_vm9, %v1373_v9, %v1371_v61 }
 0x4f9   :  { %v1379_v0 = vadd.f32 %v1374_v14, %v1328_v59  ;;  %v1380_v15 = vadd.f32 %v1378_v62, %v1329_v60 }
 0x4fb   :  { %v1385_v1 = vadd.f32 %v1383_v63, %v1379_v0  ;;  %v1386_v12 = vadd.f32 %v1383_v63, %v1380_v15 }
 0x4fd   :  { %v1387_v2 = vperm.slane %v1385_v1, 0  ;;  %v1388_v3 = vperm.slane %v1386_v12, 0 }
 0x4ff   :  { %v1389_v13 = vadd.f32 %v1387_v2, %v2023_v5  ;;  %v1390_v4 = vadd.f32 %v1388_v3, %v2026_v6  ;;  %v63_v5 = vld [vmem:[%s2200_s4] sm:$0x3] }
 0x501   :  { %v1391_v55 = vmax.f32 %v1389_v13, 0.0  ;;  %v1392_v57 = vmax.f32 %v1390_v4, 0.0 }
 0x503   :  { %v1394_v58 = vmul.f32 %v1392_v57, %v1775_v48  ;;  %v1393_v56 = vmul.f32 %v1391_v55, %v1773_v47  ;;  %v1437_v48 = vpop.permute.xlu0 %1436 }
 0x505   :  { %1411 = vmatmul.f32.vlgmr.msrb.gmra.mxu0 %v1393_v56  ;;  %1431 = vmatmul.f32.vlgmr.msra.gmra.mxu1 %v1394_v58 }
 0x582   :  { %v1412_v7 = vpop.f32.mrf.mxu0  ;;  %v1432_v25 = vpop.f32.mrf.mxu1 }
 0x583   :  { %v1433_v8 = vadd.f32 %v1432_v25, %v1412_v7 }
 0x585   :  { %1509 = vmatpush.msk.msra.mxu2 %vm1443_vm10, %v1433_v8 }
 0x586   :  { %1510 = vmatmul.msk.f32.vlgmr.msra.gmra.mxu2 %vm1439_vm11, %v63_v5 }
 0x609   :  { %v1464_v47 = vpop.f32.mrf.mxu2 }
 0x60a   :  { %v1465_v10 = vadd.f32 %v1464_v47, %v1437_v48 }
 0x60c   :  { %1468 = vst.msk [vmem:[#allocation2] sm:$0x3] %vm1467_vm12, %v1465_v10 }
 0x60d   :  { %1479 = dma.vmem_to_hbm [thread:$0]  %s1475_s17, 32, %s1477_s20, [#allocation3]  }
 0x60e   :  { %1609 = dma.done.wait [#allocation3], 32  }
 0x60f   :  { %1610 = vsyncadd [#allocation3], 4294967264 }
 0x610   :  { %1484 = vsyncpa [#allocation3], 1 }

</bundles_post_ra>
